<compile_context>
chip_gen: v7x
topology: tpu7x:2x2x1
jax: 0.10.0
libtpu: 0.0.40
codegen_flags: <defaults>
</compile_context>

<pallas_src>
import jax
import jax.numpy as jnp
from jax.experimental import pallas as pl
from jax.experimental.pallas import tpu as pltpu

IN_DIM = 28 * 28          # 784 — no K padding (last block dim equals full array dim)
HID = 256
OUT_DIM = 10
OUT_PAD = 128             # lane-dense output slab; wrapper slices [:, :10]


def mlp_kernel(x_ref, w1_ref, b1_ref, w2_ref, b2_ref, w3_ref, b3_ref, o_ref):
    # layer 1: (tb, 784) @ (784, 256), bf16 operands, f32 accumulation
    h1 = jnp.dot(x_ref[...], w1_ref[...], preferred_element_type=jnp.float32)
    h1 = jnp.maximum(h1 + b1_ref[...], 0.0).astype(jnp.bfloat16)
    # layer 2: (tb, 256) @ (256, 256)
    h2 = jnp.dot(h1, w2_ref[...], preferred_element_type=jnp.float32)
    h2 = jnp.maximum(h2 + b2_ref[...], 0.0).astype(jnp.bfloat16)
    # layer 3: (tb, 256) @ (256, 128); columns 10..127 of w3/b3 are zero padding
    out = jnp.dot(h2, w3_ref[...], preferred_element_type=jnp.float32) + b3_ref[...]
    # bf16 writeback halves output HBM traffic (accumulation was f32)
    o_ref[...] = out.astype(o_ref.dtype)


def prepare_params(params):
    """Cast + pad params for the kernel.

    params store w* as (in_features, out_features) f32 (transposed vs.
    nn.Linear.weight, so the kernel computes y = x @ W + b) and b* as
    (1, out_features) f32.
    """
    w1 = params["w1"].astype(jnp.bfloat16)                      # (784, 256)
    w2 = params["w2"].astype(jnp.bfloat16)                      # (256, 256)
    w3 = jnp.zeros((HID, OUT_PAD), jnp.bfloat16).at[:, :OUT_DIM].set(
        params["w3"].astype(jnp.bfloat16))                      # (256, 128)
    b1 = params["b1"].astype(jnp.float32)
    b2 = params["b2"].astype(jnp.float32)
    b3 = jnp.zeros((1, OUT_PAD), jnp.float32).at[:, :OUT_DIM].set(
        params["b3"].astype(jnp.float32))
    return w1, b1, w2, b2, w3, b3


def _round_up(n, m):
    return -(-n // m) * m


def mlp_forward(x, params, *, tb=1024):
    """x: (B, 784) float32.  params: dict of w1,b1,w2,b2,w3,b3 (f32, PyTorch-equivalent)."""
    B = x.shape[0]

    # Tile granularity is 256 rows (one 256x256 MXU pass on v6e/v7x; two 128-row
    # passes on v5e).  For B <= 256 a single 256-row tile is the best we can do;
    # otherwise cap tb so the "parallel" batch grid has at least 2 steps (v7x
    # megacore) and never over-pads small/medium batches.
    if B <= 256:
        tb = 256
    else:
        tb = max(256, min(tb, _round_up(-(-B // 2), 256)))
    n_tiles = -(-B // tb)               # ceil(B / tb)
    B_pad = n_tiles * tb

    # Cast matmul input to bf16; pad the batch only when B is not a tile multiple.
    x_bf = x.astype(jnp.bfloat16)
    if B_pad != B:
        x_bf = jnp.pad(x_bf, ((0, B_pad - B), (0, 0)))

    w1, b1, w2, b2, w3, b3 = prepare_params(params)

    flops = 2 * B_pad * (IN_DIM * HID + HID * HID + HID * OUT_PAD)
    bytes_accessed = (
        B_pad * IN_DIM * 2                            # bf16 activations in
        + (w1.size + w2.size + w3.size) * 2           # bf16 weights
        + (b1.size + b2.size + b3.size) * 4           # f32 biases
        + B_pad * OUT_PAD * 2                         # bf16 output
    )
    cost = pl.CostEstimate(flops=flops, transcendentals=0,
                           bytes_accessed=bytes_accessed)

    out = pl.pallas_call(
        mlp_kernel,
        out_shape=jax.ShapeDtypeStruct((B_pad, OUT_PAD), jnp.bfloat16),
        grid_spec=pltpu.PrefetchScalarGridSpec(
            num_scalar_prefetch=0,
            grid=(n_tiles,),
            in_specs=[
                pl.BlockSpec((tb, IN_DIM), lambda i: (i, 0)),     # x tile over batch
                pl.BlockSpec((IN_DIM, HID), lambda i: (0, 0)),    # w1 (resident)
                pl.BlockSpec((1, HID), lambda i: (0, 0)),         # b1
                pl.BlockSpec((HID, HID), lambda i: (0, 0)),       # w2
                pl.BlockSpec((1, HID), lambda i: (0, 0)),         # b2
                pl.BlockSpec((HID, OUT_PAD), lambda i: (0, 0)),   # w3 (padded cols)
                pl.BlockSpec((1, OUT_PAD), lambda i: (0, 0)),     # b3 (padded cols)
            ],
            out_specs=pl.BlockSpec((tb, OUT_PAD), lambda i: (i, 0)),
        ),
        compiler_params=pltpu.CompilerParams(
            dimension_semantics=("parallel",),   # batch axis shards across TCs on v7x
        ),
        cost_estimate=cost,
    )(x_bf, w1, b1, w2, b2, w3, b3)

    return out[:B, :OUT_DIM].astype(jnp.float32)


def init_params(key):
    """Deterministic init matching PyTorch nn.Linear shapes (stored transposed, f32)."""
    k1, k2, k3, k4, k5, k6 = jax.random.split(key, 6)

    def uniform_init(k, shape, fan_in):
        bound = 1.0 / jnp.sqrt(fan_in)
        return jax.random.uniform(k, shape, jnp.float32, -bound, bound)

    return {
        "w1": uniform_init(k1, (IN_DIM, HID), IN_DIM),
        "b1": uniform_init(k2, (1, HID), IN_DIM),
        "w2": uniform_init(k3, (HID, HID), HID),
        "b2": uniform_init(k4, (1, HID), HID),
        "w3": uniform_init(k5, (HID, OUT_DIM), HID),
        "b3": uniform_init(k6, (1, OUT_DIM), HID),
    }


def mlp_reference(x, p):
    """Pure-JAX reference mirroring the kernel's bf16-operand / f32-accumulate math."""
    h1 = jnp.dot(x.astype(jnp.bfloat16), p["w1"].astype(jnp.bfloat16),
                 preferred_element_type=jnp.float32) + p["b1"]
    h1 = jnp.maximum(h1, 0.0).astype(jnp.bfloat16)
    h2 = jnp.dot(h1, p["w2"].astype(jnp.bfloat16),
                 preferred_element_type=jnp.float32) + p["b2"]
    h2 = jnp.maximum(h2, 0.0).astype(jnp.bfloat16)
    out = jnp.dot(h2, p["w3"].astype(jnp.bfloat16),
                  preferred_element_type=jnp.float32) + p["b3"]
    # mirror the kernel's bf16 writeback
    return out.astype(jnp.bfloat16).astype(jnp.float32)


if __name__ == "__main__":
    key = jax.random.PRNGKey(0)
    kx, kp = jax.random.split(key)

    B = 32  # small demo batch; wrapper pads to one 256-row MXU-filling tile
    x = jax.random.normal(kx, (B, IN_DIM), jnp.float32)
    params = init_params(kp)

    out = mlp_forward(x, params)          # adaptive tb (=256 for this tiny batch)
    out = jax.block_until_ready(out)

    ref = mlp_reference(x, params)
    assert out.shape == (B, OUT_DIM)
    # bf16 operands + bf16 output => loosened tolerance vs. an f32-only check.
    assert jnp.allclose(out, ref, atol=3e-2, rtol=3e-2), "mismatch vs reference"

    print("KERNEL_OK")
</pallas_src>

<mosaic_0001>
module attributes {stable_mosaic.version = 11 : i64} {
  func.func @mlp_kernel(%arg0: i32, %arg1: memref<256x784xbf16, #tpu.memory_space<vmem>>, %arg2: memref<784x256xbf16, #tpu.memory_space<vmem>>, %arg3: memref<1x256xf32, #tpu.memory_space<vmem>>, %arg4: memref<256x256xbf16, #tpu.memory_space<vmem>>, %arg5: memref<1x256xf32, #tpu.memory_space<vmem>>, %arg6: memref<256x128xbf16, #tpu.memory_space<vmem>>, %arg7: memref<1x128xf32, #tpu.memory_space<vmem>>, %arg8: memref<256x128xbf16, #tpu.memory_space<vmem>>) attributes {dimension_semantics = [#tpu.dimension_semantics<parallel>], iteration_bounds = array<i64: 1>, scalar_prefetch = 0 : i64, scratch_operands = 0 : i64, tpu.core_type = #tpu.core_type<tc>, window_params = [{transform_indices = @transform_0, window_bounds = array<i64: 256, 784>}, {pipeline_mode = #tpu.pipeline_mode<synchronous>, transform_indices = @transform_1, window_bounds = array<i64: 784, 256>}, {pipeline_mode = #tpu.pipeline_mode<synchronous>, transform_indices = @transform_2, window_bounds = array<i64: 1, 256>}, {pipeline_mode = #tpu.pipeline_mode<synchronous>, transform_indices = @transform_3, window_bounds = array<i64: 256, 256>}, {pipeline_mode = #tpu.pipeline_mode<synchronous>, transform_indices = @transform_4, window_bounds = array<i64: 1, 256>}, {pipeline_mode = #tpu.pipeline_mode<synchronous>, transform_indices = @transform_5, window_bounds = array<i64: 256, 128>}, {pipeline_mode = #tpu.pipeline_mode<synchronous>, transform_indices = @transform_6, window_bounds = array<i64: 1, 128>}, {transform_indices = @transform_7, window_bounds = array<i64: 256, 128>}]} {
    %c0 = arith.constant 0 : index
    %c0_0 = arith.constant 0 : index
    %0 = vector.load %arg1[%c0, %c0_0] : memref<256x784xbf16, #tpu.memory_space<vmem>>, vector<256x784xbf16>
    %c0_1 = arith.constant 0 : index
    %c0_2 = arith.constant 0 : index
    %1 = vector.load %arg2[%c0_1, %c0_2] : memref<784x256xbf16, #tpu.memory_space<vmem>>, vector<784x256xbf16>
    %cst = arith.constant dense<0.000000e+00> : vector<256x256xf32>
    %2 = tpu.matmul %0, %1, %cst {dimension_numbers = #tpu.dot_dimension_numbers<[1], [0], [0], [1], [0, 0, 1, 1], [], []>} : vector<256x784xbf16>, vector<784x256xbf16>, vector<256x256xf32> -> vector<256x256xf32>
    %c0_3 = arith.constant 0 : index
    %c0_4 = arith.constant 0 : index
    %3 = vector.load %arg3[%c0_3, %c0_4] : memref<1x256xf32, #tpu.memory_space<vmem>>, vector<1x256xf32>
    %4 = vector.broadcast %3 : vector<1x256xf32> to vector<256x256xf32>
    %5 = arith.addf %2, %4 : vector<256x256xf32>
    %cst_5 = arith.constant 0.000000e+00 : f32
    %6 = vector.broadcast %cst_5 : f32 to vector<256x256xf32>
    %7 = arith.maximumf %5, %6 : vector<256x256xf32>
    %8 = arith.truncf %7 : vector<256x256xf32> to vector<256x256xbf16>
    %c0_6 = arith.constant 0 : index
    %c0_7 = arith.constant 0 : index
    %9 = vector.load %arg4[%c0_6, %c0_7] : memref<256x256xbf16, #tpu.memory_space<vmem>>, vector<256x256xbf16>
    %cst_8 = arith.constant dense<0.000000e+00> : vector<256x256xf32>
    %10 = tpu.matmul %8, %9, %cst_8 {dimension_numbers = #tpu.dot_dimension_numbers<[1], [0], [0], [1], [0, 0, 1, 1], [], []>} : vector<256x256xbf16>, vector<256x256xbf16>, vector<256x256xf32> -> vector<256x256xf32>
    %c0_9 = arith.constant 0 : index
    %c0_10 = arith.constant 0 : index
    %11 = vector.load %arg5[%c0_9, %c0_10] : memref<1x256xf32, #tpu.memory_space<vmem>>, vector<1x256xf32>
    %12 = vector.broadcast %11 : vector<1x256xf32> to vector<256x256xf32>
    %13 = arith.addf %10, %12 : vector<256x256xf32>
    %cst_11 = arith.constant 0.000000e+00 : f32
    %14 = vector.broadcast %cst_11 : f32 to vector<256x256xf32>
    %15 = arith.maximumf %13, %14 : vector<256x256xf32>
    %16 = arith.truncf %15 : vector<256x256xf32> to vector<256x256xbf16>
    %c0_12 = arith.constant 0 : index
    %c0_13 = arith.constant 0 : index
    %17 = vector.load %arg6[%c0_12, %c0_13] : memref<256x128xbf16, #tpu.memory_space<vmem>>, vector<256x128xbf16>
    %cst_14 = arith.constant dense<0.000000e+00> : vector<256x128xf32>
    %18 = tpu.matmul %16, %17, %cst_14 {dimension_numbers = #tpu.dot_dimension_numbers<[1], [0], [0], [1], [0, 0, 1, 1], [], []>} : vector<256x256xbf16>, vector<256x128xbf16>, vector<256x128xf32> -> vector<256x128xf32>
    %c0_15 = arith.constant 0 : index
    %c0_16 = arith.constant 0 : index
    %19 = vector.load %arg7[%c0_15, %c0_16] : memref<1x128xf32, #tpu.memory_space<vmem>>, vector<1x128xf32>
    %20 = vector.broadcast %19 : vector<1x128xf32> to vector<256x128xf32>
    %21 = arith.addf %18, %20 : vector<256x128xf32>
    %22 = arith.truncf %21 : vector<256x128xf32> to vector<256x128xbf16>
    %c0_17 = arith.constant 0 : index
    %c0_18 = arith.constant 0 : index
    %23 = vector.load %arg8[%c0_17, %c0_18] : memref<256x128xbf16, #tpu.memory_space<vmem>>, vector<256x128xbf16>
    tpu.vector_store %arg8[%c0_17, %c0_18], %22 {strides = array<i32>} : memref<256x128xbf16, #tpu.memory_space<vmem>>, vector<256x128xbf16>,
    return
  }
  func.func @transform_0(%arg0: i32) -> (i32, i32) {
    %c0_i32 = arith.constant 0 : i32
    %c0_i32_0 = arith.constant 0 : i32
    return %arg0, %c0_i32 : i32, i32
  }
  func.func @transform_1(%arg0: i32) -> (i32, i32) {
    %c0_i32 = arith.constant 0 : i32
    %c0_i32_0 = arith.constant 0 : i32
    %c0_i32_1 = arith.constant 0 : i32
    return %c0_i32, %c0_i32_0 : i32, i32
  }
  func.func @transform_2(%arg0: i32) -> (i32, i32) {
    %c0_i32 = arith.constant 0 : i32
    %c0_i32_0 = arith.constant 0 : i32
    %c0_i32_1 = arith.constant 0 : i32
    return %c0_i32, %c0_i32_0 : i32, i32
  }
  func.func @transform_3(%arg0: i32) -> (i32, i32) {
    %c0_i32 = arith.constant 0 : i32
    %c0_i32_0 = arith.constant 0 : i32
    %c0_i32_1 = arith.constant 0 : i32
    return %c0_i32, %c0_i32_0 : i32, i32
  }
  func.func @transform_4(%arg0: i32) -> (i32, i32) {
    %c0_i32 = arith.constant 0 : i32
    %c0_i32_0 = arith.constant 0 : i32
    %c0_i32_1 = arith.constant 0 : i32
    return %c0_i32, %c0_i32_0 : i32, i32
  }
  func.func @transform_5(%arg0: i32) -> (i32, i32) {
    %c0_i32 = arith.constant 0 : i32
    %c0_i32_0 = arith.constant 0 : i32
    %c0_i32_1 = arith.constant 0 : i32
    return %c0_i32, %c0_i32_0 : i32, i32
  }
  func.func @transform_6(%arg0: i32) -> (i32, i32) {
    %c0_i32 = arith.constant 0 : i32
    %c0_i32_0 = arith.constant 0 : i32
    %c0_i32_1 = arith.constant 0 : i32
    return %c0_i32, %c0_i32_0 : i32, i32
  }
  func.func @transform_7(%arg0: i32) -> (i32, i32) {
    %c0_i32 = arith.constant 0 : i32
    %c0_i32_0 = arith.constant 0 : i32
    return %arg0, %c0_i32 : i32, i32
  }
}

</mosaic_0001>

<bundles_post_ra>
// kernel: tpu_custom_call.1
= control target key start
LH: loop header
LB: loop body
LE: loop exit
PB: predicated region body
PF: predicated region fallthrough
CT: control target
= control target key end

     0   :  { %s5644_s0 = inlined_call_operand.vmem [shape: bf16[256,784], index: 0, kind: input, shape index: {}]   ;;  %s5645_s1 = inlined_call_operand.vmem [shape: bf16[784,256], index: 1, kind: input, shape index: {}]   ;;  %s5646_s2 = inlined_call_operand.vmem [shape: f32[1,256], index: 2, kind: input, shape index: {}]   ;;  %s5647_s3 = inlined_call_operand.vmem [shape: bf16[256,256], index: 3, kind: input, shape index: {}]   ;;  %s5648_s4 = inlined_call_operand.vmem [shape: f32[1,256], index: 4, kind: input, shape index: {}]   ;;  %s5649_s5 = inlined_call_operand.vmem [shape: bf16[256,128], index: 5, kind: input, shape index: {}]   ;;  %s5650_s6 = inlined_call_operand.vmem [shape: f32[1,128], index: 6, kind: input, shape index: {}]   ;;  %s5651_s7 = inlined_call_operand.hbm [shape: bf16[256,128], index: 7, kind: output, shape index: {}]  }
   0x1   :  { %v4004_v0 = vld [vmem:[%s5645_s1 + $0x104] ss:$8 sps:$4 sm:$0xff]   ;;  %v4006_v1 = vld [vmem:[%s5645_s1 + $0x100] ss:$8 sps:$4 sm:$0xff]   ;;  %v4007_v2 = vld [vmem:[%s5645_s1 + $0x114] ss:$8 sps:$4 sm:$0xff]  }
   0x2   :  { %1558 = vmatprep.subr.bf16.mxu0 %v4004_v0  ;;  %v4009_v3 = vld [vmem:[%s5645_s1 + $0x110] ss:$8 sps:$4 sm:$0xff]   ;;  %v4010_v4 = vld [vmem:[%s5645_s1 + $0x124] ss:$8 sps:$4 sm:$0xff]   ;;  %v4012_v5 = vld [vmem:[%s5645_s1 + $0x120] ss:$8 sps:$4 sm:$0xff]  }
   0x3   :  { %1559 = vmatpush1.bf16.msra.mxu0 %v4006_v1  ;;  %v4013_v6 = vld [vmem:[%s5645_s1 + $0x134] ss:$8 sps:$4 sm:$0xff]   ;;  %v4015_v7 = vld [vmem:[%s5645_s1 + $0x130] ss:$8 sps:$4 sm:$0xff]   ;;  %v4016_v8 = vld [vmem:[%s5645_s1 + $0x144] ss:$8 sps:$4 sm:$0xff]  }
   0x4   :  { %1560 = vmatprep.subr.bf16.mxu0 %v4007_v2  ;;  %v4018_v9 = vld [vmem:[%s5645_s1 + $0x140] ss:$8 sps:$4 sm:$0xff]   ;;  %v4019_v10 = vld [vmem:[%s5645_s1 + $0x154] ss:$8 sps:$4 sm:$0xff]   ;;  %v4021_v11 = vld [vmem:[%s5645_s1 + $0x150] ss:$8 sps:$4 sm:$0xff]  }
   0x5   :  { %v4022_v12 = vld [vmem:[%s5645_s1 + $0x164] ss:$8 sps:$4 sm:$0xff]   ;;  %v4024_v14 = vld [vmem:[%s5645_s1 + $0x160] ss:$8 sps:$4 sm:$0xff]   ;;  %v4025_v15 = vld [vmem:[%s5645_s1 + $0x174] ss:$8 sps:$4 sm:$0xff]  }
   0x6   :  { %v4054_v13 = vld [vmem:[%s5644_s0 + $0xc] ss:$28 sps:$4 sm:$0xff]   ;;  %v4027_v16 = vld [vmem:[%s5645_s1 + $0x170] ss:$8 sps:$4 sm:$0xff]   ;;  %v4031_v19 = vld [vmem:[%s5645_s1 + $0x194] ss:$8 sps:$4 sm:$0xff]  }
   0x7   :  { %1561 = vmatpush1.bf16.msra.mxu0 %v4009_v3  ;;  %1590 = vmatprep.mubr.bf16.mxu0 %v4054_v13  ;;  %v4028_v17 = vld [vmem:[%s5645_s1 + $0x184] ss:$8 sps:$4 sm:$0xff]   ;;  %v4030_v18 = vld [vmem:[%s5645_s1 + $0x180] ss:$8 sps:$4 sm:$0xff]   ;;  %v4033_v20 = vld [vmem:[%s5645_s1 + $0x190] ss:$8 sps:$4 sm:$0xff]  }
   0x8   :  { %1562 = vmatprep.subr.bf16.mxu0 %v4010_v4  ;;  %v4034_v21 = vld [vmem:[%s5645_s1 + $0x1a4] ss:$8 sps:$4 sm:$0xff]   ;;  %v4036_v22 = vld [vmem:[%s5645_s1 + $0x1a0] ss:$8 sps:$4 sm:$0xff]   ;;  %v4037_v23 = vld [vmem:[%s5645_s1 + $0x1b4] ss:$8 sps:$4 sm:$0xff]  }
   0x9   :  { %v4039_v24 = vld [vmem:[%s5645_s1 + $0x1b0] ss:$8 sps:$4 sm:$0xff]   ;;  %v4040_v25 = vld [vmem:[%s5645_s1 + $0x1c4] ss:$8 sps:$4 sm:$0xff]   ;;  %v4042_v26 = vld [vmem:[%s5645_s1 + $0x1c0] ss:$8 sps:$4 sm:$0xff]  }
   0xa   :  { %v4043_v27 = vld [vmem:[%s5645_s1 + $0x1d4] ss:$8 sps:$4 sm:$0xff]   ;;  %v4045_v28 = vld [vmem:[%s5645_s1 + $0x1d0] ss:$8 sps:$4 sm:$0xff]   ;;  %v4046_v29 = vld [vmem:[%s5645_s1 + $0x1e4] ss:$8 sps:$4 sm:$0xff]  }
   0xb   :  { %1563 = vmatpush1.bf16.msra.mxu0 %v4012_v5  ;;  %v4048_v30 = vld [vmem:[%s5645_s1 + $0x1e0] ss:$8 sps:$4 sm:$0xff]   ;;  %v4049_v31 = vld [vmem:[%s5645_s1 + $0x1f4] ss:$8 sps:$4 sm:$0xff]   ;;  %v4051_v32 = vld [vmem:[%s5645_s1 + $0x1f0] ss:$8 sps:$4 sm:$0xff]  }
   0xc   :  { %1564 = vmatprep.subr.bf16.mxu0 %v4013_v6  ;;  %v4057_v33 = vld [vmem:[%s5645_s1 + $0x204] ss:$8 sps:$4 sm:$0xff]   ;;  %v4055_v35 = vld [vmem:[%s5645_s1 + $0x200] ss:$8 sps:$4 sm:$0xff]   ;;  %v4063_v37 = vld [vmem:[%s5645_s1 + $0x214] ss:$8 sps:$4 sm:$0xff]  }
   0xd   :  { %v4052_v34 = vld [vmem:[%s5644_s0 + $0x8] ss:$28 sps:$4 sm:$0xff]   ;;  %v4061_v38 = vld [vmem:[%s5645_s1 + $0x210] ss:$8 sps:$4 sm:$0xff]   ;;  %v4060_v40 = vld [vmem:[%s5644_s0 + $0x40] ss:$28 sps:$4 sm:$0xff]  }
   0xe   :  { %v4058_v36 = vld [vmem:[%s5644_s0 + $0x44] ss:$28 sps:$4 sm:$0xff]   ;;  %v4064_v41 = vld [vmem:[%s5644_s0 + $0x7c] ss:$28 sps:$4 sm:$0xff]   ;;  %v4070_v47 = vld [vmem:[%s5644_s0 + $0xb4] ss:$28 sps:$4 sm:$0xff]  }
   0xf   :  { %1565 = vmatpush1.bf16.msra.mxu0 %v4015_v7  ;;  %v4069_v39 = vld [vmem:[%s5645_s1 + $0x224] ss:$8 sps:$4 sm:$0xff]   ;;  %v4067_v42 = vld [vmem:[%s5645_s1 + $0x220] ss:$8 sps:$4 sm:$0xff]   ;;  %v4075_v43 = vld [vmem:[%s5645_s1 + $0x234] ss:$8 sps:$4 sm:$0xff]  }
  0x10   :  { %1566 = vmatprep.subr.bf16.mxu0 %v4016_v8  ;;  %v4073_v44 = vld [vmem:[%s5645_s1 + $0x230] ss:$8 sps:$4 sm:$0xff]   ;;  %v4081_v45 = vld [vmem:[%s5645_s1 + $0x244] ss:$8 sps:$4 sm:$0xff]   ;;  %v4079_v48 = vld [vmem:[%s5645_s1 + $0x240] ss:$8 sps:$4 sm:$0xff]  }
  0x11   :  { %v4066_v46 = vld [vmem:[%s5644_s0 + $0x78] ss:$28 sps:$4 sm:$0xff]   ;;  %v4093_v51 = vld [vmem:[%s5645_s1 + $0x264] ss:$8 sps:$4 sm:$0xff]   ;;  %v4091_v54 = vld [vmem:[%s5645_s1 + $0x260] ss:$8 sps:$4 sm:$0xff]  }
  0x12   :  { %v4087_v49 = vld [vmem:[%s5645_s1 + $0x254] ss:$8 sps:$4 sm:$0xff]   ;;  %v4085_v50 = vld [vmem:[%s5645_s1 + $0x250] ss:$8 sps:$4 sm:$0xff]   ;;  %v4076_v53 = vld [vmem:[%s5644_s0 + $0xec] ss:$28 sps:$4 sm:$0xff]  }
  0x13   :  { %1567 = vmatpush1.bf16.msra.mxu0 %v4018_v9  ;;  %v4072_v52 = vld [vmem:[%s5644_s0 + $0xb0] ss:$28 sps:$4 sm:$0xff]   ;;  %v4099_v55 = vld [vmem:[%s5645_s1 + $0x274] ss:$8 sps:$4 sm:$0xff]   ;;  %v4078_v58 = vld [vmem:[%s5644_s0 + $0xe8] ss:$28 sps:$4 sm:$0xff]  }
  0x14   :  { %1568 = vmatprep.subr.bf16.mxu0 %v4019_v10  ;;  %v4097_v56 = vld [vmem:[%s5645_s1 + $0x270] ss:$8 sps:$4 sm:$0xff]   ;;  %v4105_v57 = vld [vmem:[%s5645_s1 + $0x284] ss:$8 sps:$4 sm:$0xff]   ;;  %v4103_v60 = vld [vmem:[%s5645_s1 + $0x280] ss:$8 sps:$4 sm:$0xff]  }
  0x15   :  { %v4082_v59 = vld [vmem:[%s5644_s0 + $0x124] ss:$28 sps:$4 sm:$0xff]   ;;  %v4111_v61 = vld [vmem:[%s5645_s1 + $0x294] ss:$8 sps:$4 sm:$0xff]   ;;  %v4109_v62 = vld [vmem:[%s5645_s1 + $0x290] ss:$8 sps:$4 sm:$0xff]  }
  0x16   :  { %v4117_v63 = vld [vmem:[%s5645_s1 + $0x2a4] ss:$8 sps:$4 sm:$0xff]   ;;  %v4084_v0 = vld [vmem:[%s5644_s0 + $0x120] ss:$28 sps:$4 sm:$0xff]   ;;  %v4121_v4 = vld [vmem:[%s5645_s1 + $0x2b0] ss:$8 sps:$4 sm:$0xff]  }
  0x17   :  { %1569 = vmatpush1.bf16.msra.mxu0 %v4021_v11  ;;  %v4088_v1 = vld [vmem:[%s5644_s0 + $0x15c] ss:$28 sps:$4 sm:$0xff]   ;;  %v4115_v2 = vld [vmem:[%s5645_s1 + $0x2a0] ss:$8 sps:$4 sm:$0xff]   ;;  %v4129_v5 = vld [vmem:[%s5645_s1 + $0x2c4] ss:$8 sps:$4 sm:$0xff]  }
  0x18   :  { %1570 = vmatprep.subr.bf16.mxu0 %v4022_v12  ;;  %v4123_v3 = vld [vmem:[%s5645_s1 + $0x2b4] ss:$8 sps:$4 sm:$0xff]   ;;  %v4127_v8 = vld [vmem:[%s5645_s1 + $0x2c0] ss:$8 sps:$4 sm:$0xff]   ;;  %v4133_v10 = vld [vmem:[%s5645_s1 + $0x2d0] ss:$8 sps:$4 sm:$0xff]  }
  0x19   :  { %v4090_v6 = vld [vmem:[%s5644_s0 + $0x158] ss:$28 sps:$4 sm:$0xff]   ;;  %v4141_v11 = vld [vmem:[%s5645_s1 + $0x2e4] ss:$8 sps:$4 sm:$0xff]  }
  0x1a   :  { %v4094_v7 = vld [vmem:[%s5644_s0 + $0x194] ss:$28 sps:$4 sm:$0xff]   ;;  %v4100_v13 = vld [vmem:[%s5644_s0 + $0x1cc] ss:$28 sps:$4 sm:$0xff]  }
  0x1b   :  { %1571 = vmatpush1.bf16.msra.mxu0 %v4024_v14  ;;  %v4135_v9 = vld [vmem:[%s5645_s1 + $0x2d4] ss:$8 sps:$4 sm:$0xff]   ;;  %v4096_v12 = vld [vmem:[%s5644_s0 + $0x190] ss:$28 sps:$4 sm:$0xff]   ;;  %v4139_v14 = vld [vmem:[%s5645_s1 + $0x2e0] ss:$8 sps:$4 sm:$0xff]  }
  0x1c   :  { %1572 = vmatprep.subr.bf16.mxu0 %v4025_v15  ;;  %v4147_v15 = vld [vmem:[%s5645_s1 + $0x2f4] ss:$8 sps:$4 sm:$0xff]  }
  0x1f   :  { %1573 = vmatpush1.bf16.msra.mxu0 %v4027_v16  ;;  %v4145_v16 = vld [vmem:[%s5645_s1 + $0x2f0] ss:$8 sps:$4 sm:$0xff]  }
  0x20   :  { %1574 = vmatprep.subr.bf16.mxu0 %v4028_v17  ;;  %v4175_v17 = vld [vmem:[%s5645_s1 + $0x4] ss:$8 sps:$4 sm:$0xff]  }
  0x21   :  { %1365 = vmatprep.subr.bf16.mxu1 %v4175_v17 }
  0x23   :  { %1575 = vmatpush1.bf16.msra.mxu0 %v4030_v18  ;;  %v4177_v18 = vld [vmem:[%s5645_s1] ss:$8 sps:$4 sm:$0xff]  }
  0x24   :  { %1576 = vmatprep.subr.bf16.mxu0 %v4031_v19  ;;  %v4153_v19 = vld [vmem:[%s5645_s1 + $0x304] ss:$8 sps:$4 sm:$0xff]   ;;  %1366 = vmatpush1.bf16.msra.mxu1 %v4177_v18 }
  0x27   :  { %1577 = vmatpush1.bf16.msra.mxu0 %v4033_v20  ;;  %v4180_v20 = vld [vmem:[%s5645_s1 + $0x14] ss:$8 sps:$4 sm:$0xff]  }
  0x28   :  { %1578 = vmatprep.subr.bf16.mxu0 %v4034_v21  ;;  %v4102_v21 = vld [vmem:[%s5644_s0 + $0x1c8] ss:$28 sps:$4 sm:$0xff]   ;;  %1367 = vmatprep.subr.bf16.mxu1 %v4180_v20 }
  0x2b   :  { %1579 = vmatpush1.bf16.msra.mxu0 %v4036_v22  ;;  %v4106_v22 = vld [vmem:[%s5644_s0 + $0x204] ss:$28 sps:$4 sm:$0xff]  }
  0x2c   :  { %1580 = vmatprep.subr.bf16.mxu0 %v4037_v23  ;;  %v4183_v23 = vld [vmem:[%s5645_s1 + $0x10] ss:$8 sps:$4 sm:$0xff]  }
  0x2d   :  { %1368 = vmatpush1.bf16.msra.mxu1 %v4183_v23 }
  0x2f   :  { %1581 = vmatpush1.bf16.msra.mxu0 %v4039_v24  ;;  %v4184_v24 = vld [vmem:[%s5645_s1 + $0x24] ss:$8 sps:$4 sm:$0xff]  }
  0x30   :  { %1582 = vmatprep.subr.bf16.mxu0 %v4040_v25  ;;  %v4186_v25 = vld [vmem:[%s5645_s1 + $0x20] ss:$8 sps:$4 sm:$0xff]   ;;  %1369 = vmatprep.subr.bf16.mxu1 %v4184_v24 }
  0x31   :  { %1370 = vmatpush1.bf16.msra.mxu1 %v4186_v25 }
  0x33   :  { %1583 = vmatpush1.bf16.msra.mxu0 %v4042_v26  ;;  %v4189_v26 = vld [vmem:[%s5645_s1 + $0x34] ss:$8 sps:$4 sm:$0xff]  }
  0x34   :  { %1584 = vmatprep.subr.bf16.mxu0 %v4043_v27  ;;  %v4108_v27 = vld [vmem:[%s5644_s0 + $0x200] ss:$28 sps:$4 sm:$0xff]   ;;  %1371 = vmatprep.subr.bf16.mxu1 %v4189_v26 }
  0x37   :  { %1585 = vmatpush1.bf16.msra.mxu0 %v4045_v28  ;;  %v4112_v28 = vld [vmem:[%s5644_s0 + $0x23c] ss:$28 sps:$4 sm:$0xff]  }
  0x38   :  { %1586 = vmatprep.subr.bf16.mxu0 %v4046_v29  ;;  %v4192_v29 = vld [vmem:[%s5645_s1 + $0x30] ss:$8 sps:$4 sm:$0xff]  }
  0x39   :  { %1372 = vmatpush1.bf16.msra.mxu1 %v4192_v29 }
  0x3b   :  { %1587 = vmatpush1.bf16.msra.mxu0 %v4048_v30  ;;  %v4193_v30 = vld [vmem:[%s5645_s1 + $0x44] ss:$8 sps:$4 sm:$0xff]  }
  0x3c   :  { %1588 = vmatprep.subr.bf16.mxu0 %v4049_v31  ;;  %v4195_v31 = vld [vmem:[%s5645_s1 + $0x40] ss:$8 sps:$4 sm:$0xff]   ;;  %1373 = vmatprep.subr.bf16.mxu1 %v4193_v30 }
  0x3f   :  { %1589 = vmatpush1.bf16.msra.mxu0 %v4051_v32  ;;  %v4198_v32 = vld [vmem:[%s5645_s1 + $0x54] ss:$8 sps:$4 sm:$0xff]  }
  0x40   :  { %1751 = vmatprep.subr.bf16.mxu0 %v4057_v33 }
  0x42   :  { %1591 = vmatmul.mubr.bf16.vlgmr.msra.gmra.mrb[0].mxu0 %v4052_v34 }
  0x43   :  { %1752 = vmatpush1.bf16.msra.mxu0 %v4055_v35  ;;  %1600 = vmatprep.mubr.bf16.mxu0 %v4058_v36 }
  0x44   :  { %1753 = vmatprep.subr.bf16.mxu0 %v4063_v37 }
  0x47   :  { %1754 = vmatpush1.bf16.msra.mxu0 %v4061_v38 }
  0x48   :  { %1755 = vmatprep.subr.bf16.mxu0 %v4069_v39 }
  0x4a   :  { %1601 = vmatmul.mubr.bf16.gmra.mrb[4].mxu0 %v4060_v40 }
  0x4b   :  { %1610 = vmatprep.mubr.bf16.mxu0 %v4064_v41  ;;  %1756 = vmatpush1.bf16.msra.mxu0 %v4067_v42 }
  0x4c   :  { %1757 = vmatprep.subr.bf16.mxu0 %v4075_v43 }
  0x4f   :  { %1758 = vmatpush1.bf16.msra.mxu0 %v4073_v44 }
  0x50   :  { %1759 = vmatprep.subr.bf16.mxu0 %v4081_v45 }
  0x52   :  { %1611 = vmatmul.mubr.bf16.gmra.mrb[8].mxu0 %v4066_v46 }
  0x53   :  { %1620 = vmatprep.mubr.bf16.mxu0 %v4070_v47  ;;  %1760 = vmatpush1.bf16.msra.mxu0 %v4079_v48 }
  0x54   :  { %1761 = vmatprep.subr.bf16.mxu0 %v4087_v49 }
  0x57   :  { %1762 = vmatpush1.bf16.msra.mxu0 %v4085_v50 }
  0x58   :  { %1763 = vmatprep.subr.bf16.mxu0 %v4093_v51 }
  0x5a   :  { %1621 = vmatmul.mubr.bf16.gmra.mrb[12].mxu0 %v4072_v52 }
  0x5b   :  { %1630 = vmatprep.mubr.bf16.mxu0 %v4076_v53  ;;  %1764 = vmatpush1.bf16.msra.mxu0 %v4091_v54 }
  0x5c   :  { %1765 = vmatprep.subr.bf16.mxu0 %v4099_v55 }
  0x5f   :  { %1766 = vmatpush1.bf16.msra.mxu0 %v4097_v56 }
  0x60   :  { %1767 = vmatprep.subr.bf16.mxu0 %v4105_v57 }
  0x62   :  { %1631 = vmatmul.mubr.bf16.gmra.mrb[16].mxu0 %v4078_v58 }
  0x63   :  { %1640 = vmatprep.mubr.bf16.mxu0 %v4082_v59  ;;  %1768 = vmatpush1.bf16.msra.mxu0 %v4103_v60 }
  0x64   :  { %1769 = vmatprep.subr.bf16.mxu0 %v4111_v61 }
  0x67   :  { %1770 = vmatpush1.bf16.msra.mxu0 %v4109_v62 }
  0x68   :  { %1771 = vmatprep.subr.bf16.mxu0 %v4117_v63 }
  0x6a   :  { %1641 = vmatmul.mubr.bf16.gmra.mrb[20].mxu0 %v4084_v0 }
  0x6b   :  { %1650 = vmatprep.mubr.bf16.mxu0 %v4088_v1  ;;  %1772 = vmatpush1.bf16.msra.mxu0 %v4115_v2 }
  0x6c   :  { %1773 = vmatprep.subr.bf16.mxu0 %v4123_v3 }
  0x6f   :  { %1774 = vmatpush1.bf16.msra.mxu0 %v4121_v4 }
  0x70   :  { %1775 = vmatprep.subr.bf16.mxu0 %v4129_v5 }
  0x72   :  { %1651 = vmatmul.mubr.bf16.gmra.mrb[24].mxu0 %v4090_v6 }
  0x73   :  { %1660 = vmatprep.mubr.bf16.mxu0 %v4094_v7  ;;  %1776 = vmatpush1.bf16.msra.mxu0 %v4127_v8 }
  0x74   :  { %1777 = vmatprep.subr.bf16.mxu0 %v4135_v9 }
  0x77   :  { %1778 = vmatpush1.bf16.msra.mxu0 %v4133_v10 }
  0x78   :  { %1779 = vmatprep.subr.bf16.mxu0 %v4141_v11 }
  0x7a   :  { %1661 = vmatmul.mubr.bf16.gmra.mrb[28].mxu0 %v4096_v12 }
  0x7b   :  { %1670 = vmatprep.mubr.bf16.mxu0 %v4100_v13  ;;  %1780 = vmatpush1.bf16.msra.mxu0 %v4139_v14 }
  0x7c   :  { %1781 = vmatprep.subr.bf16.mxu0 %v4147_v15 }
  0x7f   :  { %1782 = vmatpush1.bf16.msra.mxu0 %v4145_v16 }
  0x80   :  { %1944 = vmatprep.subr.bf16.mxu0 %v4153_v19 }
  0x82   :  { %1671 = vmatmul.mubr.bf16.gmra.mrb[32].mxu0 %v4102_v21 }
  0x83   :  { %1680 = vmatprep.mubr.bf16.mxu0 %v4106_v22 }
  0x8a   :  { %1681 = vmatmul.mubr.bf16.gmra.mrb[36].mxu0 %v4108_v27 }
  0x8b   :  { %1690 = vmatprep.mubr.bf16.mxu0 %v4112_v28 }
  0x8c   :  { %12 = vsyncpa [#allocation3], 0  ;;  %v4114_v33 = vld [vmem:[%s5644_s0 + $0x238] ss:$28 sps:$4 sm:$0xff]   ;;  %1374 = vmatpush1.bf16.msra.mxu1 %v4195_v31  ;;  %v4202_v36 = vld [vmem:[%s5645_s1 + $0x64] ss:$8 sps:$4 sm:$0xff]  }
  0x8d   :  { %v4118_v34 = vld [vmem:[%s5644_s0 + $0x274] ss:$28 sps:$4 sm:$0xff]   ;;  %1375 = vmatprep.subr.bf16.mxu1 %v4198_v32  ;;  %v4204_v37 = vld [vmem:[%s5645_s1 + $0x60] ss:$8 sps:$4 sm:$0xff]   ;;  %v4211_v42 = vld [vmem:[%s5645_s1 + $0x84] ss:$8 sps:$4 sm:$0xff]  }
  0x8e   :  { %v4201_v35 = vld [vmem:[%s5645_s1 + $0x50] ss:$8 sps:$4 sm:$0xff]   ;;  %v4207_v38 = vld [vmem:[%s5645_s1 + $0x74] ss:$8 sps:$4 sm:$0xff]   ;;  %v4124_v40 = vld [vmem:[%s5644_s0 + $0x2ac] ss:$28 sps:$4 sm:$0xff]  }
  0x8f   :  { %v4120_v39 = vld [vmem:[%s5644_s0 + $0x270] ss:$28 sps:$4 sm:$0xff]   ;;  %v4213_v43 = vld [vmem:[%s5645_s1 + $0x80] ss:$8 sps:$4 sm:$0xff]   ;;  %v4216_v44 = vld [vmem:[%s5645_s1 + $0x94] ss:$8 sps:$4 sm:$0xff]  }
  0x90   :  { %1376 = vmatpush1.bf16.msra.mxu1 %v4201_v35  ;;  %v4210_v41 = vld [vmem:[%s5645_s1 + $0x70] ss:$8 sps:$4 sm:$0xff]   ;;  %v4126_v45 = vld [vmem:[%s5644_s0 + $0x2a8] ss:$28 sps:$4 sm:$0xff]   ;;  %v4225_v50 = vld [vmem:[%s5645_s1 + $0xb4] ss:$8 sps:$4 sm:$0xff]  }
  0x91   :  { %1377 = vmatprep.subr.bf16.mxu1 %v4202_v36  ;;  %v4130_v46 = vld [vmem:[%s5644_s0 + $0x2e4] ss:$28 sps:$4 sm:$0xff]   ;;  %v4219_v47 = vld [vmem:[%s5645_s1 + $0x90] ss:$8 sps:$4 sm:$0xff]   ;;  %v4234_v56 = vld [vmem:[%s5645_s1 + $0xd4] ss:$8 sps:$4 sm:$0xff]  }
  0x92   :  { %1691 = vmatmul.mubr.bf16.gmra.mrb[40].mxu0 %v4114_v33  ;;  %v4220_v48 = vld [vmem:[%s5645_s1 + $0xa4] ss:$8 sps:$4 sm:$0xff]   ;;  %v4222_v49 = vld [vmem:[%s5645_s1 + $0xa0] ss:$8 sps:$4 sm:$0xff]   ;;  %v4136_v52 = vld [vmem:[%s5644_s0 + $0x31c] ss:$28 sps:$4 sm:$0xff]  }
  0x93   :  { %1700 = vmatprep.mubr.bf16.mxu0 %v4118_v34  ;;  %v4132_v51 = vld [vmem:[%s5644_s0 + $0x2e0] ss:$28 sps:$4 sm:$0xff]   ;;  %v4228_v53 = vld [vmem:[%s5645_s1 + $0xb0] ss:$8 sps:$4 sm:$0xff]   ;;  %v4229_v54 = vld [vmem:[%s5645_s1 + $0xc4] ss:$8 sps:$4 sm:$0xff]  }
  0x94   :  { %1378 = vmatpush1.bf16.msra.mxu1 %v4204_v37  ;;  %v4231_v55 = vld [vmem:[%s5645_s1 + $0xc0] ss:$8 sps:$4 sm:$0xff]   ;;  %v4138_v57 = vld [vmem:[%s5644_s0 + $0x318] ss:$28 sps:$4 sm:$0xff]   ;;  %v4238_v60 = vld [vmem:[%s5645_s1 + $0xe4] ss:$8 sps:$4 sm:$0xff]  }
  0x95   :  { %1379 = vmatprep.subr.bf16.mxu1 %v4207_v38  ;;  %v4142_v58 = vld [vmem:[%s5644_s0 + $0x354] ss:$28 sps:$4 sm:$0xff]   ;;  %v4240_v61 = vld [vmem:[%s5645_s1 + $0xe0] ss:$8 sps:$4 sm:$0xff]   ;;  %v4251_v7 = vld [vmem:[%s5644_s0 + $0x3c] ss:$28 sps:$4 sm:$0xff]  }
  0x96   :  { %v4237_v59 = vld [vmem:[%s5645_s1 + $0xd0] ss:$8 sps:$4 sm:$0xff]   ;;  %v4243_v62 = vld [vmem:[%s5645_s1 + $0xf4] ss:$8 sps:$4 sm:$0xff]   ;;  %v4249_v3 = vld [vmem:[%s5644_s0 + $0x4] ss:$28 sps:$4 sm:$0xff]  }
  0x97   :  { %v4144_v63 = vld [vmem:[%s5644_s0 + $0x350] ss:$28 sps:$4 sm:$0xff]   ;;  %v4247_v2 = vld [vmem:[%s5644_s0] ss:$28 sps:$4 sm:$0xff]   ;;  %1397 = vmatprep.mubr.bf16.mxu1 %v4249_v3  ;;  %v4253_v8 = vld [vmem:[%s5644_s0 + $0x38] ss:$28 sps:$4 sm:$0xff]  }
  0x98   :  { %1380 = vmatpush1.bf16.msra.mxu1 %v4210_v41  ;;  %v4150_v0 = vld [vmem:[%s5644_s0 + $0x14] ss:$28 sps:$4 sm:$0xff]   ;;  %v4151_v5 = vld [vmem:[%s5645_s1 + $0x300] ss:$8 sps:$4 sm:$0xff]   ;;  %v4160_v14 = vld [vmem:[%s5644_s0 + $0xbc] ss:$28 sps:$4 sm:$0xff]  }
  0x99   :  { %1381 = vmatprep.subr.bf16.mxu1 %v4211_v42  ;;  %v4246_v1 = vld [vmem:[%s5645_s1 + $0xf0] ss:$8 sps:$4 sm:$0xff]   ;;  %v4154_v6 = vld [vmem:[%s5644_s0 + $0x4c] ss:$28 sps:$4 sm:$0xff]   ;;  %v4157_v10 = vld [vmem:[%s5644_s0 + $0x84] ss:$28 sps:$4 sm:$0xff]  }
  0x9a   :  { %1701 = vmatmul.mubr.bf16.gmra.mrb[44].mxu0 %v4120_v39  ;;  %v4148_v4 = vld [vmem:[%s5644_s0 + $0x10] ss:$28 sps:$4 sm:$0xff]   ;;  %v4156_v9 = vld [vmem:[%s5644_s0 + $0x48] ss:$28 sps:$4 sm:$0xff]   ;;  %v4159_v13 = vld [vmem:[%s5644_s0 + $0x80] ss:$28 sps:$4 sm:$0xff]  }
  0x9b   :  { %1710 = vmatprep.mubr.bf16.mxu0 %v4124_v40  ;;  %v4255_v11 = vld [vmem:[%s5644_s0 + $0x74] ss:$28 sps:$4 sm:$0xff]   ;;  %v4259_v15 = vld [vmem:[%s5644_s0 + $0xac] ss:$28 sps:$4 sm:$0xff]   ;;  %v4263_v19 = vld [vmem:[%s5644_s0 + $0xe4] ss:$28 sps:$4 sm:$0xff]  }
  0x9c   :  { %1382 = vmatpush1.bf16.msra.mxu1 %v4213_v43  ;;  %v4257_v12 = vld [vmem:[%s5644_s0 + $0x70] ss:$28 sps:$4 sm:$0xff]   ;;  %v4261_v16 = vld [vmem:[%s5644_s0 + $0xa8] ss:$28 sps:$4 sm:$0xff]   ;;  %v4162_v17 = vld [vmem:[%s5644_s0 + $0xb8] ss:$28 sps:$4 sm:$0xff]  }
  0x9d   :  { %1383 = vmatprep.subr.bf16.mxu1 %v4216_v44  ;;  %v4163_v18 = vld [vmem:[%s5644_s0 + $0xf4] ss:$28 sps:$4 sm:$0xff]   ;;  %v4265_v20 = vld [vmem:[%s5644_s0 + $0xe0] ss:$28 sps:$4 sm:$0xff]   ;;  %v4166_v22 = vld [vmem:[%s5644_s0 + $0x12c] ss:$28 sps:$4 sm:$0xff]  }
  0x9e   :  { %v4165_v21 = vld [vmem:[%s5644_s0 + $0xf0] ss:$28 sps:$4 sm:$0xff]   ;;  %v4267_v23 = vld [vmem:[%s5644_s0 + $0x11c] ss:$28 sps:$4 sm:$0xff]   ;;  %v4168_v25 = vld [vmem:[%s5644_s0 + $0x128] ss:$28 sps:$4 sm:$0xff]  }
  0x9f   :  { %v4269_v24 = vld [vmem:[%s5644_s0 + $0x118] ss:$28 sps:$4 sm:$0xff]   ;;  %v4169_v26 = vld [vmem:[%s5644_s0 + $0x164] ss:$28 sps:$4 sm:$0xff]   ;;  %v4273_v28 = vld [vmem:[%s5644_s0 + $0x150] ss:$28 sps:$4 sm:$0xff]  }
  0xa0   :  { %1384 = vmatpush1.bf16.msra.mxu1 %v4219_v47  ;;  %v4271_v27 = vld [vmem:[%s5644_s0 + $0x154] ss:$28 sps:$4 sm:$0xff]   ;;  %v4171_v29 = vld [vmem:[%s5644_s0 + $0x160] ss:$28 sps:$4 sm:$0xff]   ;;  %v4275_v31 = vld [vmem:[%s5644_s0 + $0x18c] ss:$28 sps:$4 sm:$0xff]  }
  0xa1   :  { %1385 = vmatprep.subr.bf16.mxu1 %v4220_v48  ;;  %v4172_v30 = vld [vmem:[%s5644_s0 + $0x19c] ss:$28 sps:$4 sm:$0xff]   ;;  %v4277_v32 = vld [vmem:[%s5644_s0 + $0x188] ss:$28 sps:$4 sm:$0xff]   ;;  %v4178_v34 = vld [vmem:[%s5644_s0 + $0x1d4] ss:$28 sps:$4 sm:$0xff]  }
  0xa2   :  { %1711 = vmatmul.mubr.bf16.gmra.mrb[48].mxu0 %v4126_v45  ;;  %v4174_v33 = vld [vmem:[%s5644_s0 + $0x198] ss:$28 sps:$4 sm:$0xff]   ;;  %v4279_v35 = vld [vmem:[%s5644_s0 + $0x1c4] ss:$28 sps:$4 sm:$0xff]   ;;  %v4182_v37 = vld [vmem:[%s5644_s0 + $0x1d0] ss:$28 sps:$4 sm:$0xff]  }
  0xa3   :  { %1720 = vmatprep.mubr.bf16.mxu0 %v4130_v46  ;;  %v4281_v36 = vld [vmem:[%s5644_s0 + $0x1c0] ss:$28 sps:$4 sm:$0xff]   ;;  %v4187_v38 = vld [vmem:[%s5644_s0 + $0x20c] ss:$28 sps:$4 sm:$0xff]   ;;  %v4285_v40 = vld [vmem:[%s5644_s0 + $0x1f8] ss:$28 sps:$4 sm:$0xff]  }
  0xa4   :  { %1386 = vmatpush1.bf16.msra.mxu1 %v4222_v49  ;;  %v4283_v39 = vld [vmem:[%s5644_s0 + $0x1fc] ss:$28 sps:$4 sm:$0xff]   ;;  %v4191_v41 = vld [vmem:[%s5644_s0 + $0x208] ss:$28 sps:$4 sm:$0xff]   ;;  %v4287_v43 = vld [vmem:[%s5644_s0 + $0x234] ss:$28 sps:$4 sm:$0xff]  }
  0xa5   :  { %1387 = vmatprep.subr.bf16.mxu1 %v4225_v50  ;;  %v4196_v42 = vld [vmem:[%s5644_s0 + $0x244] ss:$28 sps:$4 sm:$0xff]   ;;  %v4289_v44 = vld [vmem:[%s5644_s0 + $0x230] ss:$28 sps:$4 sm:$0xff]   ;;  %v4205_v46 = vld [vmem:[%s5644_s0 + $0x27c] ss:$28 sps:$4 sm:$0xff]  }
  0xa6   :  { %v4200_v45 = vld [vmem:[%s5644_s0 + $0x240] ss:$28 sps:$4 sm:$0xff]   ;;  %v4291_v47 = vld [vmem:[%s5644_s0 + $0x26c] ss:$28 sps:$4 sm:$0xff]   ;;  %v4209_v49 = vld [vmem:[%s5644_s0 + $0x278] ss:$28 sps:$4 sm:$0xff]  }
  0xa7   :  { %v4293_v48 = vld [vmem:[%s5644_s0 + $0x268] ss:$28 sps:$4 sm:$0xff]   ;;  %v4214_v50 = vld [vmem:[%s5644_s0 + $0x2b4] ss:$28 sps:$4 sm:$0xff]   ;;  %v4236_v3 = vld [vmem:[%s5644_s0 + $0x320] ss:$28 sps:$4 sm:$0xff]  }
  0xa8   :  { %1388 = vmatpush1.bf16.msra.mxu1 %v4228_v53  ;;  %v4298_v53 = vld [vmem:[%s5647_s3] ss:$8 sps:$4 sm:$0xff]   ;;  %vm1316_vm0 = vcmask 130048  }
  0xa9   :  { %1389 = vmatprep.subr.bf16.mxu1 %v4229_v54  ;;  %v4300_v54 = vld [vmem:[%s5647_s3 + $0x4] ss:$8 sps:$4 sm:$0xff]  }
  0xaa   :  { %1721 = vmatmul.mubr.bf16.gmra.mrb[52].mxu0 %v4132_v51  ;;  %v4295_v51 = vld [vmem:[%s5644_s0 + $0x2a4] ss:$28 sps:$4 sm:$0xff]  }
  0xab   :  { %1730 = vmatprep.mubr.bf16.mxu0 %v4136_v52  ;;  %v4297_v52 = vld [vmem:[%s5644_s0 + $0x2a0] ss:$28 sps:$4 sm:$0xff]  }
  0xac   :  { %1390 = vmatpush1.bf16.msra.mxu1 %v4231_v55  ;;  %v4218_v55 = vld [vmem:[%s5644_s0 + $0x2b0] ss:$28 sps:$4 sm:$0xff]  }
  0xad   :  { %1391 = vmatprep.subr.bf16.mxu1 %v4234_v56  ;;  %v4223_v56 = vld [vmem:[%s5644_s0 + $0x2ec] ss:$28 sps:$4 sm:$0xff]  }
  0xb0   :  { %1392 = vmatpush1.bf16.msra.mxu1 %v4237_v59  ;;  %v4305_v59 = vld [vmem:[%s5647_s3 + $0x10] ss:$8 sps:$4 sm:$0xff]  }
  0xb1   :  { %1393 = vmatprep.subr.bf16.mxu1 %v4238_v60  ;;  %v4307_v60 = vld [vmem:[%s5647_s3 + $0x14] ss:$8 sps:$4 sm:$0xff]  }
  0xb2   :  { %1731 = vmatmul.mubr.bf16.gmra.mrb[56].mxu0 %v4138_v57  ;;  %v4302_v57 = vld [vmem:[%s5644_s0 + $0x2dc] ss:$28 sps:$4 sm:$0xff]  }
  0xb3   :  { %1740 = vmatprep.mubr.bf16.mxu0 %v4142_v58  ;;  %v4304_v58 = vld [vmem:[%s5644_s0 + $0x2d8] ss:$28 sps:$4 sm:$0xff]  }
  0xb4   :  { %1394 = vmatpush1.bf16.msra.mxu1 %v4240_v61  ;;  %v4227_v61 = vld [vmem:[%s5644_s0 + $0x2e8] ss:$28 sps:$4 sm:$0xff]  }
  0xb5   :  { %1395 = vmatprep.subr.bf16.mxu1 %v4243_v62  ;;  %v4232_v62 = vld [vmem:[%s5644_s0 + $0x324] ss:$28 sps:$4 sm:$0xff]  }
  0xb8   :  { %1396 = vmatpush1.bf16.msra.mxu1 %v4246_v1  ;;  %v4312_v1 = vld [vmem:[%s5647_s3 + $0x20] ss:$8 sps:$4 sm:$0xff]  }
  0xb9   :  { %2437 = vmatprep.subr.bf16.mxu1 %v4300_v54 }
  0xba   :  { %1741 = vmatmul.mubr.bf16.gmra.mrb[60].mxu0 %v4144_v63  ;;  %v4309_v63 = vld [vmem:[%s5644_s0 + $0x314] ss:$28 sps:$4 sm:$0xff]  }
  0xbb   :  { %1783 = vmatprep.mubr.bf16.mxu0 %v4150_v0  ;;  %1398 = vmatmul.mubr.bf16.vlgmr.msra.gmra.mrb[0].mxu1 %v4247_v2  ;;  %v4311_v0 = vld [vmem:[%s5644_s0 + $0x310] ss:$28 sps:$4 sm:$0xff]  }
  0xbc   :  { %1407 = vmatprep.mubr.bf16.mxu1 %v4251_v7  ;;  %2438 = vmatpush1.bf16.msra.mxu1 %v4298_v53  ;;  %v4314_v2 = vld [vmem:[%s5647_s3 + $0x24] ss:$8 sps:$4 sm:$0xff]   ;;  %v4319_v7 = vld [vmem:[%s5647_s3 + $0x30] ss:$8 sps:$4 sm:$0xff]  }
  0xbd   :  { %2439 = vmatprep.subr.bf16.mxu1 %v4307_v60  ;;  %v4356_v53 = vld [vmem:[%s5647_s3 + $0xf0] ss:$8 sps:$4 sm:$0xff]  }
  0xbe   :  { %v4308_v60 = vld [vmem:[%s5644_s0 + $0x2f0] ss:$28 sps:$4 sm:$0xff]  }
  0xc0   :  { %2440 = vmatpush1.bf16.msra.mxu1 %v4305_v59 }
  0xc1   :  { %2441 = vmatprep.subr.bf16.mxu1 %v4314_v2 }
  0xc2   :  { %1784 = vmatmul.mubr.bf16.vlgmr.msra.gmra.mrb[0].mxu0 %v4148_v4  ;;  %v4241_v4 = vld [vmem:[%s5644_s0 + $0x35c] ss:$28 sps:$4 sm:$0xff]  }
  0xc3   :  { %1945 = vmatpush1.bf16.msra.mxu0 %v4151_v5  ;;  %1793 = vmatprep.mubr.bf16.mxu0 %v4154_v6  ;;  %v4316_v5 = vld [vmem:[%s5644_s0 + $0x34c] ss:$28 sps:$4 sm:$0xff]  }
  0xc4   :  { %1408 = vmatmul.mubr.bf16.gmra.mrb[4].mxu1 %v4253_v8  ;;  %v4318_v6 = vld [vmem:[%s5644_s0 + $0x348] ss:$28 sps:$4 sm:$0xff]   ;;  %v4321_v8 = vld [vmem:[%s5647_s3 + $0x34] ss:$8 sps:$4 sm:$0xff]  }
  0xc5   :  { %1417 = vmatprep.mubr.bf16.mxu1 %v4255_v11  ;;  %2442 = vmatpush1.bf16.msra.mxu1 %v4312_v1  ;;  %v4325_v11 = vld [vmem:[%s5647_s3 + $0x44] ss:$8 sps:$4 sm:$0xff]  }
  0xc6   :  { %2443 = vmatprep.subr.bf16.mxu1 %v4321_v8  ;;  %v4315_v1 = vld [vmem:[%s5644_s0 + $0x328] ss:$28 sps:$4 sm:$0xff]  }
  0xc9   :  { %2444 = vmatpush1.bf16.msra.mxu1 %v4319_v7 }
  0xca   :  { %1794 = vmatmul.mubr.bf16.gmra.mrb[4].mxu0 %v4156_v9  ;;  %v4245_v9 = vld [vmem:[%s5644_s0 + $0x358] ss:$28 sps:$4 sm:$0xff]   ;;  %2445 = vmatprep.subr.bf16.mxu1 %v4325_v11 }
  0xcb   :  { %1803 = vmatprep.mubr.bf16.mxu0 %v4157_v10  ;;  %v4323_v10 = vld [vmem:[%s5647_s3 + $0x40] ss:$8 sps:$4 sm:$0xff]  }
  0xcc   :  { %1418 = vmatmul.mubr.bf16.gmra.mrb[8].mxu1 %v4257_v12  ;;  %v4399_v12 = vmov 0  }
  0xcd   :  { %1427 = vmatprep.mubr.bf16.mxu1 %v4259_v15  ;;  %2446 = vmatpush1.bf16.msra.mxu1 %v4323_v10  ;;  %v4250_v15 = vld [vmem:[%s5644_s0 + $0x18] ss:$28 sps:$4 sm:$0xff]  }
  0xd2   :  { %1804 = vmatmul.mubr.bf16.gmra.mrb[8].mxu0 %v4159_v13  ;;  %v4328_v13 = vld [vmem:[%s5647_s3 + $0x54] ss:$8 sps:$4 sm:$0xff]  }
  0xd3   :  { %1813 = vmatprep.mubr.bf16.mxu0 %v4160_v14  ;;  %v4326_v14 = vld [vmem:[%s5647_s3 + $0x50] ss:$8 sps:$4 sm:$0xff]   ;;  %2447 = vmatprep.subr.bf16.mxu1 %v4328_v13 }
  0xd4   :  { %1428 = vmatmul.mubr.bf16.gmra.mrb[12].mxu1 %v4261_v16  ;;  %v4331_v16 = vld [vmem:[%s5647_s3 + $0x64] ss:$8 sps:$4 sm:$0xff]  }
  0xd5   :  { %1437 = vmatprep.mubr.bf16.mxu1 %v4263_v19  ;;  %2448 = vmatpush1.bf16.msra.mxu1 %v4326_v14  ;;  %v4332_v19 = vld [vmem:[%s5647_s3 + $0x70] ss:$8 sps:$4 sm:$0xff]  }
  0xd6   :  { %2449 = vmatprep.subr.bf16.mxu1 %v4331_v16 }
  0xda   :  { %1814 = vmatmul.mubr.bf16.gmra.mrb[12].mxu0 %v4162_v17  ;;  %v4329_v17 = vld [vmem:[%s5647_s3 + $0x60] ss:$8 sps:$4 sm:$0xff]  }
  0xdb   :  { %1823 = vmatprep.mubr.bf16.mxu0 %v4163_v18  ;;  %v4334_v18 = vld [vmem:[%s5647_s3 + $0x74] ss:$8 sps:$4 sm:$0xff]   ;;  %2450 = vmatpush1.bf16.msra.mxu1 %v4329_v17 }
  0xdc   :  { %1438 = vmatmul.mubr.bf16.gmra.mrb[16].mxu1 %v4265_v20  ;;  %v4254_v20 = vld [vmem:[%s5644_s0 + $0x50] ss:$28 sps:$4 sm:$0xff]   ;;  %2451 = vmatprep.subr.bf16.mxu1 %v4334_v18 }
  0xdd   :  { %1447 = vmatprep.mubr.bf16.mxu1 %v4267_v23  ;;  %v4340_v23 = vld [vmem:[%s5647_s3 + $0x94] ss:$8 sps:$4 sm:$0xff]  }
  0xdf   :  { %2452 = vmatpush1.bf16.msra.mxu1 %v4332_v19 }
  0xe2   :  { %1824 = vmatmul.mubr.bf16.gmra.mrb[16].mxu0 %v4165_v21  ;;  %v4337_v21 = vld [vmem:[%s5647_s3 + $0x84] ss:$8 sps:$4 sm:$0xff]  }
  0xe3   :  { %1833 = vmatprep.mubr.bf16.mxu0 %v4166_v22  ;;  %v4335_v22 = vld [vmem:[%s5647_s3 + $0x80] ss:$8 sps:$4 sm:$0xff]   ;;  %2453 = vmatprep.subr.bf16.mxu1 %v4337_v21 }
  0xe4   :  { %1448 = vmatmul.mubr.bf16.gmra.mrb[20].mxu1 %v4269_v24  ;;  %v4338_v24 = vld [vmem:[%s5647_s3 + $0x90] ss:$8 sps:$4 sm:$0xff]  }
  0xe5   :  { %1457 = vmatprep.mubr.bf16.mxu1 %v4271_v27  ;;  %2454 = vmatpush1.bf16.msra.mxu1 %v4335_v22  ;;  %v4341_v27 = vld [vmem:[%s5647_s3 + $0xa0] ss:$8 sps:$4 sm:$0xff]  }
  0xe6   :  { %2455 = vmatprep.subr.bf16.mxu1 %v4340_v23 }
  0xe9   :  { %2456 = vmatpush1.bf16.msra.mxu1 %v4338_v24 }
  0xea   :  { %1834 = vmatmul.mubr.bf16.gmra.mrb[20].mxu0 %v4168_v25  ;;  %v4258_v25 = vld [vmem:[%s5644_s0 + $0x88] ss:$28 sps:$4 sm:$0xff]  }
  0xeb   :  { %1843 = vmatprep.mubr.bf16.mxu0 %v4169_v26  ;;  %v4343_v26 = vld [vmem:[%s5647_s3 + $0xa4] ss:$8 sps:$4 sm:$0xff]  }
  0xec   :  { %1458 = vmatmul.mubr.bf16.gmra.mrb[24].mxu1 %v4273_v28  ;;  %2457 = vmatprep.subr.bf16.mxu1 %v4343_v26  ;;  %v4346_v28 = vld [vmem:[%s5647_s3 + $0xb4] ss:$8 sps:$4 sm:$0xff]  }
  0xed   :  { %1467 = vmatprep.mubr.bf16.mxu1 %v4275_v31  ;;  %2458 = vmatpush1.bf16.msra.mxu1 %v4341_v27  ;;  %v4349_v31 = vld [vmem:[%s5647_s3 + $0xc4] ss:$8 sps:$4 sm:$0xff]  }
  0xee   :  { %2459 = vmatprep.subr.bf16.mxu1 %v4346_v28 }
  0xf2   :  { %1844 = vmatmul.mubr.bf16.gmra.mrb[24].mxu0 %v4171_v29  ;;  %v4344_v29 = vld [vmem:[%s5647_s3 + $0xb0] ss:$8 sps:$4 sm:$0xff]  }
  0xf3   :  { %1853 = vmatprep.mubr.bf16.mxu0 %v4172_v30  ;;  %v4262_v30 = vld [vmem:[%s5644_s0 + $0xc0] ss:$28 sps:$4 sm:$0xff]   ;;  %2460 = vmatpush1.bf16.msra.mxu1 %v4344_v29 }
  0xf4   :  { %1468 = vmatmul.mubr.bf16.gmra.mrb[28].mxu1 %v4277_v32  ;;  %v4347_v32 = vld [vmem:[%s5647_s3 + $0xc0] ss:$8 sps:$4 sm:$0xff]   ;;  %2461 = vmatprep.subr.bf16.mxu1 %v4349_v31 }
  0xf5   :  { %1477 = vmatprep.mubr.bf16.mxu1 %v4279_v35  ;;  %v4266_v35 = vld [vmem:[%s5644_s0 + $0xf8] ss:$28 sps:$4 sm:$0xff]  }
  0xf7   :  { %2462 = vmatpush1.bf16.msra.mxu1 %v4347_v32 }
  0xfa   :  { %1854 = vmatmul.mubr.bf16.gmra.mrb[28].mxu0 %v4174_v33  ;;  %v4352_v33 = vld [vmem:[%s5647_s3 + $0xd4] ss:$8 sps:$4 sm:$0xff]  }
  0xfb   :  { %1863 = vmatprep.mubr.bf16.mxu0 %v4178_v34  ;;  %v4350_v34 = vld [vmem:[%s5647_s3 + $0xd0] ss:$8 sps:$4 sm:$0xff]   ;;  %2463 = vmatprep.subr.bf16.mxu1 %v4352_v33 }
  0xfc   :  { %1478 = vmatmul.mubr.bf16.gmra.mrb[32].mxu1 %v4281_v36  ;;  %v4355_v36 = vld [vmem:[%s5647_s3 + $0xe4] ss:$8 sps:$4 sm:$0xff]  }
  0xfd   :  { %1487 = vmatprep.mubr.bf16.mxu1 %v4283_v39  ;;  %2464 = vmatpush1.bf16.msra.mxu1 %v4350_v34  ;;  %v4274_v39 = vld [vmem:[%s5644_s0 + $0x168] ss:$28 sps:$4 sm:$0xff]  }
  0xfe   :  { %2465 = vmatprep.subr.bf16.mxu1 %v4355_v36 }
 0x102   :  { %1864 = vmatmul.mubr.bf16.gmra.mrb[32].mxu0 %v4182_v37  ;;  %v4353_v37 = vld [vmem:[%s5647_s3 + $0xe0] ss:$8 sps:$4 sm:$0xff]  }
 0x103   :  { %1873 = vmatprep.mubr.bf16.mxu0 %v4187_v38  ;;  %2466 = vmatpush1.bf16.msra.mxu1 %v4353_v37  ;;  %v4270_v38 = vld [vmem:[%s5644_s0 + $0x130] ss:$28 sps:$4 sm:$0xff]  }
 0x104   :  { %1488 = vmatmul.mubr.bf16.gmra.mrb[36].mxu1 %v4285_v40  ;;  %v4278_v40 = vld [vmem:[%s5644_s0 + $0x1a0] ss:$28 sps:$4 sm:$0xff]  }
 0x105   :  { %1497 = vmatprep.mubr.bf16.mxu1 %v4287_v43  ;;  %v4290_v43 = vld [vmem:[%s5644_s0 + $0x248] ss:$28 sps:$4 sm:$0xff]  }
 0x10a   :  { %1874 = vmatmul.mubr.bf16.gmra.mrb[36].mxu0 %v4191_v41  ;;  %v4282_v41 = vld [vmem:[%s5644_s0 + $0x1d8] ss:$28 sps:$4 sm:$0xff]  }
 0x10b   :  { %1883 = vmatprep.mubr.bf16.mxu0 %v4196_v42  ;;  %v4286_v42 = vld [vmem:[%s5644_s0 + $0x210] ss:$28 sps:$4 sm:$0xff]  }
 0x10c   :  { %1498 = vmatmul.mubr.bf16.gmra.mrb[40].mxu1 %v4289_v44 }
 0x10d   :  { %1507 = vmatprep.mubr.bf16.mxu1 %v4291_v47 }
 0x112   :  { %1884 = vmatmul.mubr.bf16.gmra.mrb[40].mxu0 %v4200_v45 }
 0x113   :  { %1893 = vmatprep.mubr.bf16.mxu0 %v4205_v46 }
 0x114   :  { %1508 = vmatmul.mubr.bf16.gmra.mrb[44].mxu1 %v4293_v48  ;;  %v4294_v48 = vld [vmem:[%s5644_s0 + $0x280] ss:$28 sps:$4 sm:$0xff]  }
 0x115   :  { %1517 = vmatprep.mubr.bf16.mxu1 %v4295_v51  ;;  %v4358_v51 = vld [vmem:[%s5647_s3 + $0xf4] ss:$8 sps:$4 sm:$0xff]  }
 0x116   :  { %2467 = vmatprep.subr.bf16.mxu1 %v4358_v51 }
 0x117   :  { %2468 = vmatpush1.bf16.msra.mxu1 %v4356_v53  ;;  %v256_v53 = vlaneseq }
 0x11a   :  { %1894 = vmatmul.mubr.bf16.gmra.mrb[44].mxu0 %v4209_v49 }
 0x11b   :  { %1903 = vmatprep.mubr.bf16.mxu0 %v4214_v50 }
 0x11c   :  { %1518 = vmatmul.mubr.bf16.gmra.mrb[48].mxu1 %v4297_v52 }
 0x11d   :  { %1527 = vmatprep.mubr.bf16.mxu1 %v4302_v57 }
 0x122   :  { %1904 = vmatmul.mubr.bf16.gmra.mrb[48].mxu0 %v4218_v55  ;;  %v4301_v55 = vld [vmem:[%s5644_s0 + $0x2b8] ss:$28 sps:$4 sm:$0xff]  }
 0x123   :  { %1913 = vmatprep.mubr.bf16.mxu0 %v4223_v56 }
 0x124   :  { %1528 = vmatmul.mubr.bf16.gmra.mrb[52].mxu1 %v4304_v58 }
 0x125   :  { %1537 = vmatprep.mubr.bf16.mxu1 %v4309_v63 }
 0x12a   :  { %1914 = vmatmul.mubr.bf16.gmra.mrb[52].mxu0 %v4227_v61 }
 0x12b   :  { %1923 = vmatprep.mubr.bf16.mxu0 %v4232_v62 }
 0x12c   :  { %1538 = vmatmul.mubr.bf16.gmra.mrb[56].mxu1 %v4311_v0 }
 0x12d   :  { %1547 = vmatprep.mubr.bf16.mxu1 %v4316_v5 }
 0x132   :  { %1924 = vmatmul.mubr.bf16.gmra.mrb[56].mxu0 %v4236_v3 }
 0x133   :  { %1933 = vmatprep.mubr.bf16.mxu0 %v4241_v4 }
 0x134   :  { %1548 = vmatmul.mubr.bf16.gmra.mrb[60].mxu1 %v4318_v6  ;;  %v4322_v6 = vld [vmem:[%s5644_s0 + $0x360] ss:$28 sps:$4 sm:$0xff]  }
 0x13a   :  { %1934 = vmatmul.mubr.bf16.gmra.mrb[60].mxu0 %v4245_v9 }
 0x13b   :  { %1976 = vmatprep.mubr.bf16.mxu0 %v4399_v12 }
 0x142   :  { %3408 = vmatmul.mubr.msk.bf16.vlgmr.msra.gmra.mrb[0].mxu0 %vm1316_vm0, %v4250_v15 }
 0x143   :  { %1986 = vmatprep.mubr.bf16.mxu0 %v4399_v12 }
 0x14a   :  { %3409 = vmatmul.mubr.msk.bf16.gmra.mrb[4].mxu0 %vm1316_vm0, %v4254_v20 }
 0x14b   :  { %1996 = vmatprep.mubr.bf16.mxu0 %v4399_v12 }
 0x152   :  { %3410 = vmatmul.mubr.msk.bf16.gmra.mrb[8].mxu0 %vm1316_vm0, %v4258_v25 }
 0x153   :  { %2006 = vmatprep.mubr.bf16.mxu0 %v4399_v12 }
 0x15a   :  { %3411 = vmatmul.mubr.msk.bf16.gmra.mrb[12].mxu0 %vm1316_vm0, %v4262_v30 }
 0x15b   :  { %2016 = vmatprep.mubr.bf16.mxu0 %v4399_v12 }
 0x162   :  { %3412 = vmatmul.mubr.msk.bf16.gmra.mrb[16].mxu0 %vm1316_vm0, %v4266_v35 }
 0x163   :  { %2026 = vmatprep.mubr.bf16.mxu0 %v4399_v12 }
 0x16a   :  { %3413 = vmatmul.mubr.msk.bf16.gmra.mrb[20].mxu0 %vm1316_vm0, %v4270_v38 }
 0x16b   :  { %2036 = vmatprep.mubr.bf16.mxu0 %v4399_v12 }
 0x172   :  { %3414 = vmatmul.mubr.msk.bf16.gmra.mrb[24].mxu0 %vm1316_vm0, %v4274_v39 }
 0x173   :  { %2046 = vmatprep.mubr.bf16.mxu0 %v4399_v12 }
 0x17a   :  { %3415 = vmatmul.mubr.msk.bf16.gmra.mrb[28].mxu0 %vm1316_vm0, %v4278_v40 }
 0x17b   :  { %2056 = vmatprep.mubr.bf16.mxu0 %v4399_v12 }
 0x182   :  { %3416 = vmatmul.mubr.msk.bf16.gmra.mrb[32].mxu0 %vm1316_vm0, %v4282_v41 }
 0x183   :  { %2066 = vmatprep.mubr.bf16.mxu0 %v4399_v12 }
 0x18a   :  { %3417 = vmatmul.mubr.msk.bf16.gmra.mrb[36].mxu0 %vm1316_vm0, %v4286_v42 }
 0x18b   :  { %2076 = vmatprep.mubr.bf16.mxu0 %v4399_v12 }
 0x18e   :  { %v5169_v44 = vpop.f32.mrb[0].mxu1 }
 0x18f   :  { %v5171_v45 = vpop.f32.mrb[1].mxu1 }
 0x190   :  { %v5174_v46 = vpop.f32.mrb[2].mxu1 }
 0x191   :  { %v5177_v47 = vpop.f32.mrb[3].mxu1 }
 0x192   :  { %3418 = vmatmul.mubr.msk.bf16.gmra.mrb[40].mxu0 %vm1316_vm0, %v4290_v43 }
 0x193   :  { %2086 = vmatprep.mubr.bf16.mxu0 %v4399_v12 }
 0x197   :  { %v5182_v49 = vpop.f32.mrb[4].mxu1 }
 0x198   :  { %v5184_v50 = vpop.f32.mrb[5].mxu1 }
 0x199   :  { %v5190_v52 = vpop.f32.mrb[6].mxu1 }
 0x19a   :  { %3419 = vmatmul.mubr.msk.bf16.gmra.mrb[44].mxu0 %vm1316_vm0, %v4294_v48  ;;  %v5196_v54 = vpop.f32.mrb[7].mxu1  ;;  %v4359_v48 = vld [vmem:[%s5649_s5 + $0x40] sm:$0xff]  }
 0x19b   :  { %2096 = vmatprep.mubr.bf16.mxu0 %v4399_v12  ;;  %3632 = vmatprep.subr.bf16.mxu1 %v4359_v48 }
 0x19f   :  { %v5201_v56 = vpop.f32.mrb[8].mxu1 }
 0x1a0   :  { %v5203_v57 = vpop.f32.mrb[9].mxu1 }
 0x1a1   :  { %v5206_v58 = vpop.f32.mrb[10].mxu1 }
 0x1a2   :  { %3420 = vmatmul.mubr.msk.bf16.gmra.mrb[48].mxu0 %vm1316_vm0, %v4301_v55  ;;  %v5209_v59 = vpop.f32.mrb[11].mxu1 }
 0x1a3   :  { %2106 = vmatprep.mubr.bf16.mxu0 %v4399_v12 }
 0x1a7   :  { %v5214_v61 = vpop.f32.mrb[12].mxu1 }
 0x1a8   :  { %v5216_v62 = vpop.f32.mrb[13].mxu1 }
 0x1a9   :  { %v5219_v63 = vpop.f32.mrb[14].mxu1 }
 0x1aa   :  { %3421 = vmatmul.mubr.msk.bf16.gmra.mrb[52].mxu0 %vm1316_vm0, %v4308_v60  ;;  %v5222_v0 = vpop.f32.mrb[15].mxu1 }
 0x1ab   :  { %2116 = vmatprep.mubr.bf16.mxu0 %v4399_v12 }
 0x1af   :  { %v5227_v2 = vpop.f32.mrb[16].mxu1 }
 0x1b0   :  { %v5229_v3 = vpop.f32.mrb[17].mxu1 }
 0x1b1   :  { %v5232_v4 = vpop.f32.mrb[18].mxu1 }
 0x1b2   :  { %3422 = vmatmul.mubr.msk.bf16.gmra.mrb[56].mxu0 %vm1316_vm0, %v4315_v1  ;;  %v5235_v5 = vpop.f32.mrb[19].mxu1  ;;  %v5324_v1 = vshrl.u32 %v256_v53, 7 }
 0x1b3   :  { %2126 = vmatprep.mubr.bf16.mxu0 %v4399_v12 }
 0x1b4   :  { %5670 = vst [vmem:[#allocation19_spill] sm:$0xff] %v5324_v1 }
 0x1b7   :  { %v5240_v7 = vpop.f32.mrb[20].mxu1 }
 0x1b8   :  { %v5242_v8 = vpop.f32.mrb[21].mxu1 }
 0x1b9   :  { %v5245_v9 = vpop.f32.mrb[22].mxu1 }
 0x1ba   :  { %3423 = vmatmul.mubr.msk.bf16.gmra.mrb[60].mxu0 %vm1316_vm0, %v4322_v6  ;;  %v5247_v10 = vpop.f32.mrb[23].mxu1 }
 0x1bf   :  { %v5249_v11 = vpop.f32.mrb[24].mxu1 }
 0x1c0   :  { %v5251_v13 = vpop.f32.mrb[25].mxu1 }
 0x1c1   :  { %v5253_v12 = vpop.f32.mrb[26].mxu1 }
 0x1c2   :  { %v5255_v14 = vpop.f32.mrb[27].mxu1 }
 0x1c7   :  { %v5257_v15 = vpop.f32.mrb[28].mxu1 }
 0x1c8   :  { %v5259_v16 = vpop.f32.mrb[29].mxu1 }
 0x1c9   :  { %v5261_v17 = vpop.f32.mrb[30].mxu1 }
 0x1ca   :  { %v5263_v18 = vpop.f32.mrb[31].mxu1 }
 0x1cf   :  { %v5265_v19 = vpop.f32.mrb[32].mxu1 }
 0x1d0   :  { %v5267_v20 = vpop.f32.mrb[33].mxu1 }
 0x1d1   :  { %v5269_v21 = vpop.f32.mrb[34].mxu1 }
 0x1d2   :  { %v5271_v22 = vpop.f32.mrb[35].mxu1 }
 0x1d7   :  { %v5273_v23 = vpop.f32.mrb[36].mxu1 }
 0x1d8   :  { %v5275_v24 = vpop.f32.mrb[37].mxu1 }
 0x1d9   :  { %v5277_v25 = vpop.f32.mrb[38].mxu1 }
 0x1da   :  { %v5279_v26 = vpop.f32.mrb[39].mxu1 }
 0x1df   :  { %v5281_v27 = vpop.f32.mrb[40].mxu1 }
 0x1e0   :  { %v5283_v28 = vpop.f32.mrb[41].mxu1 }
 0x1e1   :  { %v5285_v29 = vpop.f32.mrb[42].mxu1 }
 0x1e2   :  { %v5287_v30 = vpop.f32.mrb[43].mxu1 }
 0x1e7   :  { %v5289_v31 = vpop.f32.mrb[44].mxu1 }
 0x1e8   :  { %v5291_v32 = vpop.f32.mrb[45].mxu1 }
 0x1e9   :  { %v5293_v33 = vpop.f32.mrb[46].mxu1 }
 0x1ea   :  { %5656 = vst [vmem:[#allocation5_spill] sm:$0xff] %v5293_v33  ;;  %v5295_v34 = vpop.f32.mrb[47].mxu1 }
 0x1eb   :  { %5657 = vst [vmem:[#allocation6_spill] sm:$0xff] %v5295_v34 }
 0x1ef   :  { %v5297_v35 = vpop.f32.mrb[48].mxu1 }
 0x1f0   :  { %5658 = vst [vmem:[#allocation7_spill] sm:$0xff] %v5297_v35  ;;  %v5299_v36 = vpop.f32.mrb[49].mxu1 }
 0x1f1   :  { %5659 = vst [vmem:[#allocation8_spill] sm:$0xff] %v5299_v36  ;;  %v5301_v37 = vpop.f32.mrb[50].mxu1 }
 0x1f2   :  { %5660 = vst [vmem:[#allocation9_spill] sm:$0xff] %v5301_v37  ;;  %v5303_v38 = vpop.f32.mrb[51].mxu1 }
 0x1f3   :  { %5661 = vst [vmem:[#allocation10_spill] sm:$0xff] %v5303_v38 }
 0x1f7   :  { %v5305_v39 = vpop.f32.mrb[52].mxu1 }
 0x1f8   :  { %5662 = vst [vmem:[#allocation11_spill] sm:$0xff] %v5305_v39  ;;  %v5307_v40 = vpop.f32.mrb[53].mxu1 }
 0x1f9   :  { %5663 = vst [vmem:[#allocation12_spill] sm:$0xff] %v5307_v40  ;;  %v5309_v41 = vpop.f32.mrb[54].mxu1  ;;  %v5655_v40 = vsub.s32 1, %v5324_v1 }
 0x1fa   :  { %5664 = vst [vmem:[#allocation13_spill] sm:$0xff] %v5309_v41  ;;  %v5311_v42 = vpop.f32.mrb[55].mxu1 }
 0x1fb   :  { %5665 = vst [vmem:[#allocation14_spill] sm:$0xff] %v5311_v42 }
 0x1ff   :  { %v5313_v43 = vpop.f32.mrb[56].mxu1 }
 0x200   :  { %5666 = vst [vmem:[#allocation15_spill] sm:$0xff] %v5313_v43  ;;  %v5318_v51 = vpop.f32.mrb[57].mxu1  ;;  %v5652_v43 = vsub.s32 0, %v5324_v1 }
 0x201   :  { %5667 = vst [vmem:[#allocation16_spill] sm:$0xff] %v5318_v51  ;;  %v5320_v55 = vpop.f32.mrb[58].mxu1  ;;  %v254_v51 = vld [vmem:[%s5646_s2] sm:$0x3] }
 0x202   :  { %5668 = vst [vmem:[#allocation17_spill] sm:$0xff] %v5320_v55  ;;  %v5322_v60 = vpop.f32.mrb[59].mxu1  ;;  %v5341_v48 = vrot.slane %v254_v51, %v5652_v43  ;;  %v5345_v53 = vrot.slane %v254_v51, %v5655_v40 }
 0x203   :  { %5669 = vst [vmem:[#allocation18_spill] sm:$0xff] %v5322_v60 }
 0x204   :  { %v1404_v60 = vadd.f32 %v5174_v46, %v5341_v48  ;;  %v1406_v43 = vadd.f32 %v5177_v47, %v5345_v53  ;;  %v1412_v46 = vadd.f32 %v5184_v50, %v5345_v53  ;;  %v4360_v47 = vld [vmem:[%s5649_s5] sm:$0xff]  }
 0x207   :  { %v5326_v6 = vpop.f32.mrb[60].mxu1 }
 0x208   :  { %5671 = vst [vmem:[#allocation20_spill] sm:$0xff] %v5326_v6  ;;  %v5328_v41 = vpop.f32.mrb[61].mxu1 }
 0x209   :  { %5672 = vst [vmem:[#allocation21_spill] sm:$0xff] %v5328_v41  ;;  %v5331_v42 = vpop.f32.mrb[62].mxu1  ;;  %v1400_v41 = vadd.f32 %v5169_v44, %v5341_v48  ;;  %v1410_v44 = vadd.f32 %v5182_v49, %v5341_v48  ;;  %v4361_v49 = vld [vmem:[%s5649_s5 + $0x48] sm:$0xff]  }
 0x20a   :  { %5673 = vst [vmem:[#allocation22_spill] sm:$0xff] %v5331_v42  ;;  %v5337_v55 = vpop.f32.mrb[63].mxu1  ;;  %v1402_v42 = vadd.f32 %v5171_v45, %v5345_v53 }
 0x20b   :  { %5674 = vst [vmem:[#allocation23_spill] sm:$0xff] %v5337_v55 }
 0x215   :  { %v1978_v6 = vpop.f32.mrb[0].mxu0 }
 0x216   :  { %v3745_v39 = vadd.f32 %v1978_v6, %v1400_v41  ;;  %v1980_v55 = vpop.f32.mrb[1].mxu0 }
 0x217   :  { %v3747_v38 = vadd.f32 %v1980_v55, %v1402_v42  ;;  %v1982_v37 = vpop.f32.mrb[2].mxu0  ;;  %v1420_v55 = vadd.f32 %v5201_v56, %v5341_v48  ;;  %v1424_v56 = vadd.f32 %v5206_v58, %v5341_v48  ;;  %v4366_v58 = vld [vmem:[%s5649_s5 + $0x18] sm:$0xff]  }
 0x218   :  { %v3749_v1 = vadd.f32 %v1982_v37, %v1404_v60  ;;  %v1984_v51 = vpop.f32.mrb[3].mxu0  ;;  %v2137_v36 = vmax.f32 %v3745_v39, 0.0  ;;  %v1414_v37 = vadd.f32 %v5190_v52, %v5341_v48  ;;  %v4362_v52 = vld [vmem:[%s5649_s5 + $0x8] sm:$0xff]  }
 0x219   :  { %v3751_v40 = vadd.f32 %v1984_v51, %v1406_v43  ;;  %v2138_v45 = vmax.f32 %v3747_v38, 0.0  ;;  %v1416_v38 = vadd.f32 %v5196_v54, %v5345_v53  ;;  %v4363_v54 = vld [vmem:[%s5649_s5 + $0x50] sm:$0xff]   ;;  %v1422_v51 = vadd.f32 %v5203_v57, %v5345_v53 }
 0x21a   :  { %v2139_v35 = vmax.f32 %v3749_v1, 0.0  ;;  %v1426_v57 = vadd.f32 %v5209_v59, %v5345_v53  ;;  %v4367_v59 = vld [vmem:[%s5649_s5 + $0x60] sm:$0xff]  }
 0x21b   :  { %v2140_v34 = vmax.f32 %v3751_v40, 0.0 }
 0x21c   :  { %v2201_v41 = vpack.c.bf16 %v2139_v35, %v2137_v36 }
 0x21d   :  { %v2202_v6 = vpack.c.bf16 %v2140_v34, %v2138_v45  ;;  %v1988_v33 = vpop.f32.mrb[4].mxu0 }
 0x21e   :  { %v3753_v39 = vadd.f32 %v1988_v33, %v1410_v44  ;;  %v1990_v42 = vpop.f32.mrb[5].mxu0 }
 0x21f   :  { %v3755_v50 = vadd.f32 %v1990_v42, %v1412_v46  ;;  %v1992_v35 = vpop.f32.mrb[6].mxu0  ;;  %2469 = vmatprep.mubr.bf16.mxu1 %v2202_v6 }
 0x220   :  { %v3757_v34 = vadd.f32 %v1992_v35, %v1414_v37  ;;  %v1994_v36 = vpop.f32.mrb[7].mxu0  ;;  %2470 = vmatmul.mubr.bf16.vlgmr.msra.gmra.mrb[64].mxu1 %v2201_v41  ;;  %v2141_v33 = vmax.f32 %v3753_v39, 0.0  ;;  %v4364_v41 = vld [vmem:[%s5649_s5 + $0x10] sm:$0xff]   ;;  %v4365_v37 = vld [vmem:[%s5649_s5 + $0x58] sm:$0xff]  }
 0x221   :  { %v3759_v40 = vadd.f32 %v1994_v36, %v1416_v38  ;;  %3633 = vmatpush3.bf16.msra.mxu1 %v4360_v47  ;;  %v2142_v60 = vmax.f32 %v3755_v50, 0.0  ;;  %v1430_v36 = vadd.f32 %v5214_v61, %v5341_v48  ;;  %v1434_v61 = vadd.f32 %v5219_v63, %v5341_v48  ;;  %v4370_v63 = vld [vmem:[%s5649_s5 + $0x28] sm:$0xff]  }
 0x222   :  { %v2143_v43 = vmax.f32 %v3757_v34, 0.0  ;;  %3634 = vmatprep.subr.bf16.mxu1 %v4361_v49 }
 0x223   :  { %v2144_v1 = vmax.f32 %v3759_v40, 0.0 }
 0x224   :  { %v2203_v44 = vpack.c.bf16 %v2143_v43, %v2141_v33  ;;  %v1432_v33 = vadd.f32 %v5216_v62, %v5345_v53  ;;  %v1436_v62 = vadd.f32 %v5222_v0, %v5345_v53  ;;  %v4371_v0 = vld [vmem:[%s5649_s5 + $0x70] sm:$0xff]  }
 0x225   :  { %v2204_v45 = vpack.c.bf16 %v2144_v1, %v2142_v60  ;;  %v1998_v46 = vpop.f32.mrb[8].mxu0  ;;  %3635 = vmatpush3.bf16.msra.mxu1 %v4362_v52  ;;  %v4368_v60 = vld [vmem:[%s5649_s5 + $0x20] sm:$0xff]  }
 0x226   :  { %v3761_v6 = vadd.f32 %v1998_v46, %v1420_v55  ;;  %v2000_v47 = vpop.f32.mrb[9].mxu0  ;;  %3636 = vmatprep.subr.bf16.mxu1 %v4363_v54 }
 0x227   :  { %v3763_v39 = vadd.f32 %v2000_v47, %v1422_v51  ;;  %v2002_v42 = vpop.f32.mrb[10].mxu0  ;;  %2479 = vmatprep.mubr.bf16.mxu1 %v2204_v45 }
 0x228   :  { %v3765_v49 = vadd.f32 %v2002_v42, %v1424_v56  ;;  %v2004_v38 = vpop.f32.mrb[11].mxu0  ;;  %2480 = vmatmul.mubr.bf16.gmra.mrb[68].mxu1 %v2203_v44  ;;  %v2145_v35 = vmax.f32 %v3761_v6, 0.0  ;;  %v4369_v44 = vld [vmem:[%s5649_s5 + $0x68] sm:$0xff]  }
 0x229   :  { %v3767_v50 = vadd.f32 %v2004_v38, %v1426_v57  ;;  %3637 = vmatpush3.bf16.msra.mxu1 %v4364_v41  ;;  %v2146_v40 = vmax.f32 %v3763_v39, 0.0  ;;  %v1440_v57 = vadd.f32 %v5227_v2, %v5341_v48  ;;  %v1444_v2 = vadd.f32 %v5232_v4, %v5341_v48  ;;  %v4374_v4 = vld [vmem:[%s5649_s5 + $0x38] sm:$0xff]  }
 0x22a   :  { %v2147_v34 = vmax.f32 %v3765_v49, 0.0  ;;  %3638 = vmatprep.subr.bf16.mxu1 %v4365_v37  ;;  %v1442_v49 = vadd.f32 %v5229_v3, %v5345_v53  ;;  %v1446_v3 = vadd.f32 %v5235_v5, %v5345_v53 }
 0x22b   :  { %v2148_v52 = vmax.f32 %v3767_v50, 0.0 }
 0x22c   :  { %v2205_v43 = vpack.c.bf16 %v2147_v34, %v2145_v35  ;;  %v4372_v35 = vld [vmem:[%s5649_s5 + $0x30] sm:$0xff]  }
 0x22d   :  { %v2206_v55 = vpack.c.bf16 %v2148_v52, %v2146_v40  ;;  %v2008_v54 = vpop.f32.mrb[12].mxu0  ;;  %3639 = vmatpush3.bf16.msra.mxu1 %v4366_v58 }
 0x22e   :  { %v3769_v1 = vadd.f32 %v2008_v54, %v1430_v36  ;;  %v2010_v51 = vpop.f32.mrb[13].mxu0  ;;  %3640 = vmatprep.subr.bf16.mxu1 %v4367_v59  ;;  %v4373_v59 = vld [vmem:[%s5649_s5 + $0x78] sm:$0xff]  }
 0x22f   :  { %v3771_v45 = vadd.f32 %v2010_v51, %v1432_v33  ;;  %v2012_v46 = vpop.f32.mrb[14].mxu0  ;;  %2489 = vmatprep.mubr.bf16.mxu1 %v2206_v55  ;;  %v1452_v51 = vadd.f32 %v5242_v8, %v5345_v53 }
 0x230   :  { %v3773_v41 = vadd.f32 %v2012_v46, %v1434_v61  ;;  %v2014_v56 = vpop.f32.mrb[15].mxu0  ;;  %2490 = vmatmul.mubr.bf16.gmra.mrb[72].mxu1 %v2205_v43  ;;  %v2149_v47 = vmax.f32 %v3769_v1, 0.0  ;;  %v1450_v61 = vadd.f32 %v5240_v7, %v5341_v48  ;;  %v1454_v46 = vadd.f32 %v5245_v9, %v5341_v48 }
 0x231   :  { %v3775_v6 = vadd.f32 %v2014_v56, %v1436_v62  ;;  %3641 = vmatpush3.bf16.msra.mxu1 %v4368_v60  ;;  %v2150_v39 = vmax.f32 %v3771_v45, 0.0  ;;  %v1462_v9 = vadd.f32 %v5251_v13, %v5345_v53 }
 0x232   :  { %v2151_v37 = vmax.f32 %v3773_v41, 0.0  ;;  %3642 = vmatprep.subr.bf16.mxu1 %v4369_v44 }
 0x233   :  { %v2152_v42 = vmax.f32 %v3775_v6, 0.0  ;;  %v1456_v6 = vadd.f32 %v5247_v10, %v5345_v53 }
 0x234   :  { %v2207_v38 = vpack.c.bf16 %v2151_v37, %v2149_v47 }
 0x235   :  { %v2208_v50 = vpack.c.bf16 %v2152_v42, %v2150_v39  ;;  %v2018_v58 = vpop.f32.mrb[16].mxu0  ;;  %3643 = vmatpush3.bf16.msra.mxu1 %v4370_v63  ;;  %v1460_v39 = vadd.f32 %v5249_v11, %v5341_v48 }
 0x236   :  { %v3777_v34 = vadd.f32 %v2018_v58, %v1440_v57  ;;  %v2020_v36 = vpop.f32.mrb[17].mxu0  ;;  %3644 = vmatprep.subr.bf16.mxu1 %v4371_v0  ;;  %v1464_v58 = vadd.f32 %v5253_v12, %v5341_v48  ;;  %v1472_v12 = vadd.f32 %v5259_v16, %v5345_v53 }
 0x237   :  { %v3779_v40 = vadd.f32 %v2020_v36, %v1442_v49  ;;  %v2022_v52 = vpop.f32.mrb[18].mxu0  ;;  %2499 = vmatprep.mubr.bf16.mxu1 %v2208_v50 }
 0x238   :  { %v3781_v33 = vadd.f32 %v2022_v52, %v1444_v2  ;;  %v2024_v43 = vpop.f32.mrb[19].mxu0  ;;  %2500 = vmatmul.mubr.bf16.gmra.mrb[76].mxu1 %v2207_v38  ;;  %v2153_v54 = vmax.f32 %v3777_v34, 0.0  ;;  %v1466_v34 = vadd.f32 %v5255_v14, %v5345_v53 }
 0x239   :  { %v3783_v55 = vadd.f32 %v2024_v43, %v1446_v3  ;;  %3645 = vmatpush3.bf16.msra.mxu1 %v4372_v35  ;;  %v2154_v1 = vmax.f32 %v3779_v40, 0.0 }
 0x23a   :  { %v2155_v60 = vmax.f32 %v3781_v33, 0.0  ;;  %3646 = vmatprep.subr.bf16.mxu1 %v4373_v59  ;;  %v1470_v33 = vadd.f32 %v5257_v15, %v5341_v48 }
 0x23b   :  { %v2156_v5 = vmax.f32 %v3783_v55, 0.0 }
 0x23c   :  { %v2209_v44 = vpack.c.bf16 %v2155_v60, %v2153_v54  ;;  %v1474_v60 = vadd.f32 %v5261_v17, %v5341_v48  ;;  %v1482_v17 = vadd.f32 %v5267_v20, %v5345_v53 }
 0x23d   :  { %v2210_v62 = vpack.c.bf16 %v2156_v5, %v2154_v1  ;;  %v2028_v45 = vpop.f32.mrb[20].mxu0  ;;  %3647 = vmatpush3.bf16.msra.mxu1 %v4374_v4  ;;  %v1476_v5 = vadd.f32 %v5263_v18, %v5345_v53 }
 0x23e   :  { %v3785_v41 = vadd.f32 %v2028_v45, %v1450_v61  ;;  %v2030_v56 = vpop.f32.mrb[21].mxu0 }
 0x23f   :  { %v3787_v63 = vadd.f32 %v2030_v56, %v1452_v51  ;;  %v2032_v7 = vpop.f32.mrb[22].mxu0  ;;  %2509 = vmatprep.mubr.bf16.mxu1 %v2210_v62 }
 0x240   :  { %v3789_v47 = vadd.f32 %v2032_v7, %v1454_v46  ;;  %v2034_v37 = vpop.f32.mrb[23].mxu0  ;;  %2510 = vmatmul.mubr.bf16.gmra.mrb[80].mxu1 %v2209_v44  ;;  %v2157_v8 = vmax.f32 %v3785_v41, 0.0  ;;  %v1480_v41 = vadd.f32 %v5265_v19, %v5341_v48 }
 0x241   :  { %v3791_v57 = vadd.f32 %v2034_v37, %v1456_v6  ;;  %v2158_v42 = vmax.f32 %v3787_v63, 0.0 }
 0x242   :  { %v2159_v0 = vmax.f32 %v3789_v47, 0.0  ;;  %v1484_v47 = vadd.f32 %v5269_v21, %v5341_v48  ;;  %v1492_v21 = vadd.f32 %v5275_v24, %v5345_v53 }
 0x243   :  { %v2160_v49 = vmax.f32 %v3791_v57, 0.0 }
 0x244   :  { %v2211_v38 = vpack.c.bf16 %v2159_v0, %v2157_v8  ;;  %v1486_v8 = vadd.f32 %v5271_v22, %v5345_v53 }
 0x245   :  { %v2212_v50 = vpack.c.bf16 %v2160_v49, %v2158_v42  ;;  %v2038_v10 = vpop.f32.mrb[24].mxu0 }
 0x246   :  { %v3793_v35 = vadd.f32 %v2038_v10, %v1460_v39  ;;  %v2040_v2 = vpop.f32.mrb[25].mxu0 }
 0x247   :  { %v3795_v36 = vadd.f32 %v2040_v2, %v1462_v9  ;;  %v2042_v59 = vpop.f32.mrb[26].mxu0  ;;  %2519 = vmatprep.mubr.bf16.mxu1 %v2212_v50  ;;  %v1494_v2 = vadd.f32 %v5277_v25, %v5341_v48  ;;  %v1502_v25 = vadd.f32 %v5283_v28, %v5345_v53 }
 0x248   :  { %v3797_v11 = vadd.f32 %v2042_v59, %v1464_v58  ;;  %v2044_v3 = vpop.f32.mrb[27].mxu0  ;;  %2520 = vmatmul.mubr.bf16.gmra.mrb[84].mxu1 %v2211_v38  ;;  %v2161_v52 = vmax.f32 %v3793_v35, 0.0  ;;  %v1490_v38 = vadd.f32 %v5273_v23, %v5341_v48  ;;  %v1496_v59 = vadd.f32 %v5279_v26, %v5345_v53 }
 0x249   :  { %v3799_v40 = vadd.f32 %v2044_v3, %v1466_v34  ;;  %v2162_v43 = vmax.f32 %v3795_v36, 0.0 }
 0x24a   :  { %v2163_v13 = vmax.f32 %v3797_v11, 0.0 }
 0x24b   :  { %v2164_v55 = vmax.f32 %v3799_v40, 0.0 }
 0x24c   :  { %v2213_v4 = vpack.c.bf16 %v2163_v13, %v2161_v52 }
 0x24d   :  { %v2214_v54 = vpack.c.bf16 %v2164_v55, %v2162_v43  ;;  %v2048_v14 = vpop.f32.mrb[28].mxu0 }
 0x24e   :  { %v3801_v61 = vadd.f32 %v2048_v14, %v1470_v33  ;;  %v2050_v1 = vpop.f32.mrb[29].mxu0  ;;  %v1500_v33 = vadd.f32 %v5281_v27, %v5341_v48 }
 0x24f   :  { %v3803_v51 = vadd.f32 %v2050_v1, %v1472_v12  ;;  %v2052_v44 = vpop.f32.mrb[30].mxu0  ;;  %2529 = vmatprep.mubr.bf16.mxu1 %v2214_v54  ;;  %v1504_v54 = vadd.f32 %v5285_v29, %v5341_v48  ;;  %v1512_v29 = vadd.f32 %v5291_v32, %v5345_v53 }
 0x250   :  { %v3805_v15 = vadd.f32 %v2052_v44, %v1474_v60  ;;  %v2054_v62 = vpop.f32.mrb[31].mxu0  ;;  %2530 = vmatmul.mubr.bf16.gmra.mrb[88].mxu1 %v2213_v4  ;;  %v2165_v46 = vmax.f32 %v3801_v61, 0.0  ;;  %v1506_v61 = vadd.f32 %v5287_v30, %v5345_v53 }
 0x251   :  { %v3807_v45 = vadd.f32 %v2054_v62, %v1476_v5  ;;  %v2166_v56 = vmax.f32 %v3803_v51, 0.0  ;;  %v1510_v62 = vadd.f32 %v5289_v31, %v5341_v48 }
 0x252   :  { %v2167_v16 = vmax.f32 %v3805_v15, 0.0 }
 0x253   :  { %v2168_v6 = vmax.f32 %v3807_v45, 0.0 }
 0x254   :  { %v2215_v63 = vpack.c.bf16 %v2167_v16, %v2165_v46 }
 0x255   :  { %v2216_v7 = vpack.c.bf16 %v2168_v6, %v2166_v56  ;;  %v2058_v18 = vpop.f32.mrb[32].mxu0  ;;  %v5675_v56 = vld [vmem:[#allocation5_spill] sm:$0xff] }
 0x256   :  { %v3809_v37 = vadd.f32 %v2058_v18, %v1480_v41  ;;  %v2060_v57 = vpop.f32.mrb[33].mxu0  ;;  %v1514_v6 = vadd.f32 %v5675_v56, %v5341_v48 }
 0x257   :  { %v3811_v0 = vadd.f32 %v2060_v57, %v1482_v17  ;;  %v2062_v39 = vpop.f32.mrb[34].mxu0  ;;  %2539 = vmatprep.mubr.bf16.mxu1 %v2216_v7  ;;  %v5676_v7 = vld [vmem:[#allocation6_spill] sm:$0xff] }
 0x258   :  { %v3813_v19 = vadd.f32 %v2062_v39, %v1484_v47  ;;  %v2064_v42 = vpop.f32.mrb[35].mxu0  ;;  %2540 = vmatmul.mubr.bf16.gmra.mrb[92].mxu1 %v2215_v63  ;;  %v2169_v9 = vmax.f32 %v3809_v37, 0.0  ;;  %v1516_v18 = vadd.f32 %v5676_v7, %v5345_v53  ;;  %v5677_v39 = vld [vmem:[#allocation7_spill] sm:$0xff]  ;;  %v5687_v7 = vld [vmem:[#allocation17_spill] sm:$0xff] }
 0x259   :  { %v3815_v49 = vadd.f32 %v2064_v42, %v1486_v8  ;;  %v2170_v50 = vmax.f32 %v3811_v0, 0.0 }
 0x25a   :  { %v2171_v20 = vmax.f32 %v3813_v19, 0.0  ;;  %v1520_v19 = vadd.f32 %v5677_v39, %v5341_v48 }
 0x25b   :  { %v2172_v10 = vmax.f32 %v3815_v49, 0.0 }
 0x25c   :  { %v2217_v58 = vpack.c.bf16 %v2171_v20, %v2169_v9  ;;  %v5678_v9 = vld [vmem:[#allocation8_spill] sm:$0xff] }
 0x25d   :  { %v2218_v35 = vpack.c.bf16 %v2172_v10, %v2170_v50  ;;  %v2068_v22 = vpop.f32.mrb[36].mxu0  ;;  %v1522_v20 = vadd.f32 %v5678_v9, %v5345_v53  ;;  %v5689_v9 = vld [vmem:[#allocation20_spill] sm:$0xff] }
 0x25e   :  { %v3817_v34 = vadd.f32 %v2068_v22, %v1490_v38  ;;  %v2070_v36 = vpop.f32.mrb[37].mxu0 }
 0x25f   :  { %v3819_v11 = vadd.f32 %v2070_v36, %v1492_v21  ;;  %v2072_v3 = vpop.f32.mrb[38].mxu0  ;;  %2549 = vmatprep.mubr.bf16.mxu1 %v2218_v35  ;;  %v5679_v21 = vld [vmem:[#allocation9_spill] sm:$0xff] }
 0x260   :  { %v3821_v23 = vadd.f32 %v2072_v3, %v1494_v2  ;;  %v2074_v40 = vpop.f32.mrb[39].mxu0  ;;  %2550 = vmatmul.mubr.bf16.gmra.mrb[96].mxu1 %v2217_v58  ;;  %v2173_v13 = vmax.f32 %v3817_v34, 0.0  ;;  %v1524_v58 = vadd.f32 %v5679_v21, %v5341_v48  ;;  %v5680_v2 = vld [vmem:[#allocation10_spill] sm:$0xff] }
 0x261   :  { %v3823_v52 = vadd.f32 %v2074_v40, %v1496_v59  ;;  %v2174_v43 = vmax.f32 %v3819_v11, 0.0  ;;  %v1526_v34 = vadd.f32 %v5680_v2, %v5345_v53  ;;  %v5691_v2 = vld [vmem:[#allocation22_spill] sm:$0xff] }
 0x262   :  { %v2175_v24 = vmax.f32 %v3821_v23, 0.0 }
 0x263   :  { %v2176_v55 = vmax.f32 %v3823_v52, 0.0 }
 0x264   :  { %v2219_v12 = vpack.c.bf16 %v2175_v24, %v2173_v13  ;;  %v5681_v13 = vld [vmem:[#allocation11_spill] sm:$0xff] }
 0x265   :  { %v2220_v4 = vpack.c.bf16 %v2176_v55, %v2174_v43  ;;  %v2078_v26 = vpop.f32.mrb[40].mxu0  ;;  %v1530_v24 = vadd.f32 %v5681_v13, %v5341_v48  ;;  %v5682_v55 = vld [vmem:[#allocation12_spill] sm:$0xff] }
 0x266   :  { %v3825_v14 = vadd.f32 %v2078_v26, %v1500_v33  ;;  %v2080_v60 = vpop.f32.mrb[41].mxu0 }
 0x267   :  { %v3827_v1 = vadd.f32 %v2080_v60, %v1502_v25  ;;  %v2082_v5 = vpop.f32.mrb[42].mxu0  ;;  %2559 = vmatprep.mubr.bf16.mxu1 %v2220_v4  ;;  %v1532_v25 = vadd.f32 %v5682_v55, %v5345_v53 }
 0x268   :  { %v3829_v27 = vadd.f32 %v2082_v5, %v1504_v54  ;;  %v2084_v51 = vpop.f32.mrb[43].mxu0  ;;  %2560 = vmatmul.mubr.bf16.gmra.mrb[100].mxu1 %v2219_v12  ;;  %v2177_v15 = vmax.f32 %v3825_v14, 0.0  ;;  %v5683_v54 = vld [vmem:[#allocation13_spill] sm:$0xff] }
 0x269   :  { %v3831_v44 = vadd.f32 %v2084_v51, %v1506_v61  ;;  %v2178_v45 = vmax.f32 %v3827_v1, 0.0  ;;  %v1534_v14 = vadd.f32 %v5683_v54, %v5341_v48  ;;  %v5684_v1 = vld [vmem:[#allocation14_spill] sm:$0xff] }
 0x26a   :  { %v2179_v28 = vmax.f32 %v3829_v27, 0.0  ;;  %v1536_v5 = vadd.f32 %v5684_v1, %v5345_v53 }
 0x26b   :  { %v2180_v46 = vmax.f32 %v3831_v44, 0.0 }
 0x26c   :  { %v2221_v16 = vpack.c.bf16 %v2179_v28, %v2177_v15 }
 0x26d   :  { %v2222_v41 = vpack.c.bf16 %v2180_v46, %v2178_v45  ;;  %v2088_v30 = vpop.f32.mrb[44].mxu0  ;;  %v5685_v46 = vld [vmem:[#allocation15_spill] sm:$0xff] }
 0x26e   :  { %v3833_v17 = vadd.f32 %v2088_v30, %v1510_v62  ;;  %v2090_v63 = vpop.f32.mrb[45].mxu0  ;;  %v5686_v30 = vld [vmem:[#allocation16_spill] sm:$0xff] }
 0x26f   :  { %v3835_v47 = vadd.f32 %v2090_v63, %v1512_v29  ;;  %v2092_v37 = vpop.f32.mrb[46].mxu0  ;;  %2569 = vmatprep.mubr.bf16.mxu1 %v2222_v41  ;;  %v1540_v29 = vadd.f32 %v5685_v46, %v5341_v48  ;;  %v1542_v56 = vadd.f32 %v5686_v30, %v5345_v53 }
 0x270   :  { %v3837_v31 = vadd.f32 %v2092_v37, %v1514_v6  ;;  %v2094_v57 = vpop.f32.mrb[47].mxu0  ;;  %2570 = vmatmul.mubr.bf16.gmra.mrb[104].mxu1 %v2221_v16  ;;  %v2181_v0 = vmax.f32 %v3833_v17, 0.0 }
 0x271   :  { %v3839_v8 = vadd.f32 %v2094_v57, %v1516_v18  ;;  %v2182_v42 = vmax.f32 %v3835_v47, 0.0  ;;  %v1544_v18 = vadd.f32 %v5687_v7, %v5341_v48 }
 0x272   :  { %v2183_v32 = vmax.f32 %v3837_v31, 0.0  ;;  %v5688_v31 = vld [vmem:[#allocation18_spill] sm:$0xff] }
 0x273   :  { %v2184_v49 = vmax.f32 %v3839_v8, 0.0  ;;  %v1546_v57 = vadd.f32 %v5688_v31, %v5345_v53 }
 0x274   :  { %v2223_v38 = vpack.c.bf16 %v2183_v32, %v2181_v0 }
 0x275   :  { %v2224_v50 = vpack.c.bf16 %v2184_v49, %v2182_v42  ;;  %v2098_v10 = vpop.f32.mrb[48].mxu0 }
 0x276   :  { %v3841_v35 = vadd.f32 %v2098_v10, %v1520_v19  ;;  %v2100_v22 = vpop.f32.mrb[49].mxu0  ;;  %v5690_v10 = vld [vmem:[#allocation21_spill] sm:$0xff] }
 0x277   :  { %v3843_v36 = vadd.f32 %v2100_v22, %v1522_v20  ;;  %v2102_v59 = vpop.f32.mrb[50].mxu0  ;;  %2579 = vmatprep.mubr.bf16.mxu1 %v2224_v50  ;;  %v1550_v20 = vadd.f32 %v5689_v9, %v5341_v48  ;;  %v1552_v21 = vadd.f32 %v5690_v10, %v5345_v53 }
 0x278   :  { %v3845_v11 = vadd.f32 %v2102_v59, %v1524_v58  ;;  %v2104_v3 = vpop.f32.mrb[51].mxu0  ;;  %2580 = vmatmul.mubr.bf16.gmra.mrb[108].mxu1 %v2223_v38  ;;  %v2185_v40 = vmax.f32 %v3841_v35, 0.0 }
 0x279   :  { %v3847_v23 = vadd.f32 %v2104_v3, %v1526_v34  ;;  %v2186_v33 = vmax.f32 %v3843_v36, 0.0  ;;  %v1554_v34 = vadd.f32 %v5691_v2, %v5341_v48  ;;  %v2265_v48 = vld [vmem:[%s5648_s4] sm:$0x3] }
 0x27a   :  { %v2187_v52 = vmax.f32 %v3845_v11, 0.0  ;;  %v5692_v11 = vld [vmem:[#allocation23_spill] sm:$0xff] }
 0x27b   :  { %v2188_v43 = vmax.f32 %v3847_v23, 0.0  ;;  %v1556_v3 = vadd.f32 %v5692_v11, %v5345_v53  ;;  %v5693_v53 = vld [vmem:[#allocation19_spill] sm:$0xff] }
 0x27c   :  { %v2225_v12 = vpack.c.bf16 %v2187_v52, %v2185_v40 }
 0x27d   :  { %v2226_v4 = vpack.c.bf16 %v2188_v43, %v2186_v33  ;;  %v2108_v26 = vpop.f32.mrb[52].mxu0 }
 0x27e   :  { %v3849_v60 = vadd.f32 %v2108_v26, %v1530_v24  ;;  %v2110_v61 = vpop.f32.mrb[53].mxu0  ;;  %v5694_v26 = vsub.s32 0, %v5693_v53 }
 0x27f   :  { %v3851_v27 = vadd.f32 %v2110_v61, %v1532_v25  ;;  %v2112_v51 = vpop.f32.mrb[54].mxu0  ;;  %2589 = vmatprep.mubr.bf16.mxu1 %v2226_v4 }
 0x280   :  { %v3853_v44 = vadd.f32 %v2112_v51, %v1534_v14  ;;  %v2114_v15 = vpop.f32.mrb[55].mxu0  ;;  %2590 = vmatmul.mubr.bf16.gmra.mrb[112].mxu1 %v2225_v12  ;;  %v2189_v62 = vmax.f32 %v3849_v60, 0.0  ;;  %v5525_v54 = vrot.slane %v2265_v48, %v5694_v26  ;;  %v5695_v14 = vsub.s32 1, %v5693_v53 }
 0x281   :  { %v3855_v28 = vadd.f32 %v2114_v15, %v1536_v5  ;;  %v2190_v16 = vmax.f32 %v3851_v27, 0.0 }
 0x282   :  { %v2191_v45 = vmax.f32 %v3853_v44, 0.0  ;;  %v5529_v60 = vrot.slane %v2265_v48, %v5695_v14 }
 0x283   :  { %v2192_v41 = vmax.f32 %v3855_v28, 0.0 }
 0x284   :  { %v2227_v6 = vpack.c.bf16 %v2191_v45, %v2189_v62 }
 0x285   :  { %v2228_v17 = vpack.c.bf16 %v2192_v41, %v2190_v16  ;;  %v2118_v63 = vpop.f32.mrb[56].mxu0 }
 0x286   :  { %v3857_v47 = vadd.f32 %v2118_v63, %v1540_v29  ;;  %v2120_v37 = vpop.f32.mrb[57].mxu0 }
 0x287   :  { %v3859_v8 = vadd.f32 %v2120_v37, %v1542_v56  ;;  %v2122_v0 = vpop.f32.mrb[58].mxu0  ;;  %2599 = vmatprep.mubr.bf16.mxu1 %v2228_v17 }
 0x288   :  { %v3861_v32 = vadd.f32 %v2122_v0, %v1544_v18  ;;  %v2124_v39 = vpop.f32.mrb[59].mxu0  ;;  %2600 = vmatmul.mubr.bf16.gmra.mrb[116].mxu1 %v2227_v6  ;;  %v2193_v42 = vmax.f32 %v3857_v47, 0.0 }
 0x289   :  { %v3863_v19 = vadd.f32 %v2124_v39, %v1546_v57  ;;  %v2194_v38 = vmax.f32 %v3859_v8, 0.0 }
 0x28a   :  { %v2195_v49 = vmax.f32 %v3861_v32, 0.0 }
 0x28b   :  { %v2196_v50 = vmax.f32 %v3863_v19, 0.0 }
 0x28c   :  { %v2229_v58 = vpack.c.bf16 %v2195_v49, %v2193_v42 }
 0x28d   :  { %v2230_v35 = vpack.c.bf16 %v2196_v50, %v2194_v38  ;;  %v2128_v22 = vpop.f32.mrb[60].mxu0 }
 0x28e   :  { %v3865_v36 = vadd.f32 %v2128_v22, %v1550_v20  ;;  %v2130_v59 = vpop.f32.mrb[61].mxu0 }
 0x28f   :  { %v3867_v23 = vadd.f32 %v2130_v59, %v1552_v21  ;;  %v2132_v40 = vpop.f32.mrb[62].mxu0  ;;  %2609 = vmatprep.mubr.bf16.mxu1 %v2230_v35 }
 0x290   :  { %v3869_v52 = vadd.f32 %v2132_v40, %v1554_v34  ;;  %v2134_v13 = vpop.f32.mrb[63].mxu0  ;;  %2610 = vmatmul.mubr.bf16.gmra.mrb[120].mxu1 %v2229_v58  ;;  %v2197_v33 = vmax.f32 %v3865_v36, 0.0 }
 0x291   :  { %v3871_v24 = vadd.f32 %v2134_v13, %v1556_v3  ;;  %v2198_v55 = vmax.f32 %v3867_v23, 0.0 }
 0x292   :  { %v2199_v43 = vmax.f32 %v3869_v52, 0.0 }
 0x293   :  { %v2200_v25 = vmax.f32 %v3871_v24, 0.0 }
 0x294   :  { %v2231_v12 = vpack.c.bf16 %v2199_v43, %v2197_v33 }
 0x295   :  { %v2232_v4 = vpack.c.bf16 %v2200_v25, %v2198_v55 }
 0x297   :  { %2619 = vmatprep.mubr.bf16.mxu1 %v2232_v4 }
 0x298   :  { %2620 = vmatmul.mubr.bf16.gmra.mrb[124].mxu1 %v2231_v12 }
 0x2f3   :  { %v2471_v61 = vpop.f32.mrb[64].mxu1 }
 0x2f4   :  { %v2472_v1 = vadd.f32 %v2471_v61, %v5525_v54  ;;  %v2473_v5 = vpop.f32.mrb[65].mxu1 }
 0x2f5   :  { %v2474_v27 = vadd.f32 %v2473_v5, %v5529_v60  ;;  %v2475_v51 = vpop.f32.mrb[66].mxu1 }
 0x2f6   :  { %v2476_v44 = vadd.f32 %v2475_v51, %v5525_v54  ;;  %v2477_v15 = vpop.f32.mrb[67].mxu1  ;;  %v2630_v62 = vmax.f32 %v2472_v1, 0.0 }
 0x2f7   :  { %v2478_v28 = vadd.f32 %v2477_v15, %v5529_v60  ;;  %v2631_v46 = vmax.f32 %v2474_v27, 0.0 }
 0x2f8   :  { %v2632_v45 = vmax.f32 %v2476_v44, 0.0 }
 0x2f9   :  { %v2633_v29 = vmax.f32 %v2478_v28, 0.0 }
 0x2fa   :  { %v2694_v16 = vpack.c.bf16 %v2632_v45, %v2630_v62 }
 0x2fb   :  { %v2695_v41 = vpack.c.bf16 %v2633_v29, %v2631_v46  ;;  %v2481_v30 = vpop.f32.mrb[68].mxu1 }
 0x2fc   :  { %v2482_v56 = vadd.f32 %v2481_v30, %v5525_v54  ;;  %v2483_v6 = vpop.f32.mrb[69].mxu1 }
 0x2fd   :  { %v2484_v17 = vadd.f32 %v2483_v6, %v5529_v60  ;;  %v2485_v63 = vpop.f32.mrb[70].mxu1  ;;  %2893 = vmatprep.mubr.bf16.mxu1 %v2695_v41 }
 0x2fe   :  { %v2486_v7 = vadd.f32 %v2485_v63, %v5525_v54  ;;  %v2487_v18 = vpop.f32.mrb[71].mxu1  ;;  %2894 = vmatmul.mubr.bf16.vlgmr.msra.gmra.mrb[128].mxu1 %v2694_v16  ;;  %v2634_v37 = vmax.f32 %v2482_v56, 0.0 }
 0x2ff   :  { %v2488_v47 = vadd.f32 %v2487_v18, %v5529_v60  ;;  %v2635_v57 = vmax.f32 %v2484_v17, 0.0 }
 0x300   :  { %v2636_v31 = vmax.f32 %v2486_v7, 0.0 }
 0x301   :  { %v2637_v8 = vmax.f32 %v2488_v47, 0.0 }
 0x302   :  { %v2696_v0 = vpack.c.bf16 %v2636_v31, %v2634_v37 }
 0x303   :  { %v2697_v32 = vpack.c.bf16 %v2637_v8, %v2635_v57  ;;  %v2491_v39 = vpop.f32.mrb[72].mxu1 }
 0x304   :  { %v2492_v19 = vadd.f32 %v2491_v39, %v5525_v54  ;;  %v2493_v42 = vpop.f32.mrb[73].mxu1 }
 0x305   :  { %v2494_v49 = vadd.f32 %v2493_v42, %v5529_v60  ;;  %v2495_v9 = vpop.f32.mrb[74].mxu1  ;;  %2901 = vmatprep.mubr.bf16.mxu1 %v2697_v32 }
 0x306   :  { %v2496_v20 = vadd.f32 %v2495_v9, %v5525_v54  ;;  %v2497_v38 = vpop.f32.mrb[75].mxu1  ;;  %2902 = vmatmul.mubr.bf16.gmra.mrb[132].mxu1 %v2696_v0  ;;  %v2638_v10 = vmax.f32 %v2492_v19, 0.0 }
 0x307   :  { %v2498_v50 = vadd.f32 %v2497_v38, %v5529_v60  ;;  %v2639_v58 = vmax.f32 %v2494_v49, 0.0 }
 0x308   :  { %v2640_v21 = vmax.f32 %v2496_v20, 0.0 }
 0x309   :  { %v2641_v35 = vmax.f32 %v2498_v50, 0.0 }
 0x30a   :  { %v2698_v22 = vpack.c.bf16 %v2640_v21, %v2638_v10 }
 0x30b   :  { %v2699_v2 = vpack.c.bf16 %v2641_v35, %v2639_v58  ;;  %v2501_v34 = vpop.f32.mrb[76].mxu1 }
 0x30c   :  { %v2502_v36 = vadd.f32 %v2501_v34, %v5525_v54  ;;  %v2503_v59 = vpop.f32.mrb[77].mxu1 }
 0x30d   :  { %v2504_v11 = vadd.f32 %v2503_v59, %v5529_v60  ;;  %v2505_v3 = vpop.f32.mrb[78].mxu1  ;;  %2909 = vmatprep.mubr.bf16.mxu1 %v2699_v2 }
 0x30e   :  { %v2506_v23 = vadd.f32 %v2505_v3, %v5525_v54  ;;  %v2507_v40 = vpop.f32.mrb[79].mxu1  ;;  %2910 = vmatmul.mubr.bf16.gmra.mrb[136].mxu1 %v2698_v22  ;;  %v2642_v13 = vmax.f32 %v2502_v36, 0.0 }
 0x30f   :  { %v2508_v52 = vadd.f32 %v2507_v40, %v5529_v60  ;;  %v2643_v33 = vmax.f32 %v2504_v11, 0.0 }
 0x310   :  { %v2644_v24 = vmax.f32 %v2506_v23, 0.0 }
 0x311   :  { %v2645_v43 = vmax.f32 %v2508_v52, 0.0 }
 0x312   :  { %v2700_v55 = vpack.c.bf16 %v2644_v24, %v2642_v13 }
 0x313   :  { %v2701_v25 = vpack.c.bf16 %v2645_v43, %v2643_v33  ;;  %v2511_v12 = vpop.f32.mrb[80].mxu1 }
 0x314   :  { %v2512_v4 = vadd.f32 %v2511_v12, %v5525_v54  ;;  %v2513_v48 = vpop.f32.mrb[81].mxu1 }
 0x315   :  { %v2514_v53 = vadd.f32 %v2513_v48, %v5529_v60  ;;  %v2515_v26 = vpop.f32.mrb[82].mxu1  ;;  %2917 = vmatprep.mubr.bf16.mxu1 %v2701_v25 }
 0x316   :  { %v2516_v14 = vadd.f32 %v2515_v26, %v5525_v54  ;;  %v2517_v61 = vpop.f32.mrb[83].mxu1  ;;  %2918 = vmatmul.mubr.bf16.gmra.mrb[140].mxu1 %v2700_v55  ;;  %v2646_v5 = vmax.f32 %v2512_v4, 0.0 }
 0x317   :  { %v2518_v1 = vadd.f32 %v2517_v61, %v5529_v60  ;;  %v2647_v51 = vmax.f32 %v2514_v53, 0.0 }
 0x318   :  { %v2648_v27 = vmax.f32 %v2516_v14, 0.0 }
 0x319   :  { %v2649_v44 = vmax.f32 %v2518_v1, 0.0 }
 0x31a   :  { %v2702_v15 = vpack.c.bf16 %v2648_v27, %v2646_v5 }
 0x31b   :  { %v2703_v28 = vpack.c.bf16 %v2649_v44, %v2647_v51  ;;  %v2521_v62 = vpop.f32.mrb[84].mxu1 }
 0x31c   :  { %v2522_v45 = vadd.f32 %v2521_v62, %v5525_v54  ;;  %v2523_v46 = vpop.f32.mrb[85].mxu1 }
 0x31d   :  { %v2524_v29 = vadd.f32 %v2523_v46, %v5529_v60  ;;  %v2525_v16 = vpop.f32.mrb[86].mxu1  ;;  %2925 = vmatprep.mubr.bf16.mxu1 %v2703_v28 }
 0x31e   :  { %v2526_v41 = vadd.f32 %v2525_v16, %v5525_v54  ;;  %v2527_v30 = vpop.f32.mrb[87].mxu1  ;;  %2926 = vmatmul.mubr.bf16.gmra.mrb[144].mxu1 %v2702_v15  ;;  %v2650_v6 = vmax.f32 %v2522_v45, 0.0 }
 0x31f   :  { %v2528_v56 = vadd.f32 %v2527_v30, %v5529_v60  ;;  %v2651_v63 = vmax.f32 %v2524_v29, 0.0 }
 0x320   :  { %v2652_v17 = vmax.f32 %v2526_v41, 0.0 }
 0x321   :  { %v2653_v7 = vmax.f32 %v2528_v56, 0.0 }
 0x322   :  { %v2704_v18 = vpack.c.bf16 %v2652_v17, %v2650_v6 }
 0x323   :  { %v2705_v47 = vpack.c.bf16 %v2653_v7, %v2651_v63  ;;  %v2531_v37 = vpop.f32.mrb[88].mxu1 }
 0x324   :  { %v2532_v31 = vadd.f32 %v2531_v37, %v5525_v54  ;;  %v2533_v57 = vpop.f32.mrb[89].mxu1 }
 0x325   :  { %v2534_v8 = vadd.f32 %v2533_v57, %v5529_v60  ;;  %v2535_v0 = vpop.f32.mrb[90].mxu1  ;;  %2933 = vmatprep.mubr.bf16.mxu1 %v2705_v47 }
 0x326   :  { %v2536_v32 = vadd.f32 %v2535_v0, %v5525_v54  ;;  %v2537_v39 = vpop.f32.mrb[91].mxu1  ;;  %2934 = vmatmul.mubr.bf16.gmra.mrb[148].mxu1 %v2704_v18  ;;  %v2654_v42 = vmax.f32 %v2532_v31, 0.0 }
 0x327   :  { %v2538_v19 = vadd.f32 %v2537_v39, %v5529_v60  ;;  %v2655_v9 = vmax.f32 %v2534_v8, 0.0 }
 0x328   :  { %v2656_v49 = vmax.f32 %v2536_v32, 0.0 }
 0x329   :  { %v2657_v20 = vmax.f32 %v2538_v19, 0.0 }
 0x32a   :  { %v2706_v38 = vpack.c.bf16 %v2656_v49, %v2654_v42 }
 0x32b   :  { %v2707_v50 = vpack.c.bf16 %v2657_v20, %v2655_v9  ;;  %v2541_v10 = vpop.f32.mrb[92].mxu1 }
 0x32c   :  { %v2542_v21 = vadd.f32 %v2541_v10, %v5525_v54  ;;  %v2543_v58 = vpop.f32.mrb[93].mxu1 }
 0x32d   :  { %v2544_v35 = vadd.f32 %v2543_v58, %v5529_v60  ;;  %v2545_v22 = vpop.f32.mrb[94].mxu1  ;;  %2941 = vmatprep.mubr.bf16.mxu1 %v2707_v50 }
 0x32e   :  { %v2546_v2 = vadd.f32 %v2545_v22, %v5525_v54  ;;  %v2547_v34 = vpop.f32.mrb[95].mxu1  ;;  %2942 = vmatmul.mubr.bf16.gmra.mrb[152].mxu1 %v2706_v38  ;;  %v2658_v59 = vmax.f32 %v2542_v21, 0.0 }
 0x32f   :  { %v2548_v36 = vadd.f32 %v2547_v34, %v5529_v60  ;;  %v2659_v3 = vmax.f32 %v2544_v35, 0.0 }
 0x330   :  { %v2660_v11 = vmax.f32 %v2546_v2, 0.0 }
 0x331   :  { %v2661_v23 = vmax.f32 %v2548_v36, 0.0 }
 0x332   :  { %v2708_v40 = vpack.c.bf16 %v2660_v11, %v2658_v59 }
 0x333   :  { %v2709_v52 = vpack.c.bf16 %v2661_v23, %v2659_v3  ;;  %v2551_v13 = vpop.f32.mrb[96].mxu1 }
 0x334   :  { %v2552_v24 = vadd.f32 %v2551_v13, %v5525_v54  ;;  %v2553_v33 = vpop.f32.mrb[97].mxu1 }
 0x335   :  { %v2554_v43 = vadd.f32 %v2553_v33, %v5529_v60  ;;  %v2555_v55 = vpop.f32.mrb[98].mxu1  ;;  %2949 = vmatprep.mubr.bf16.mxu1 %v2709_v52 }
 0x336   :  { %v2556_v25 = vadd.f32 %v2555_v55, %v5525_v54  ;;  %v2557_v12 = vpop.f32.mrb[99].mxu1  ;;  %2950 = vmatmul.mubr.bf16.gmra.mrb[156].mxu1 %v2708_v40  ;;  %v2662_v48 = vmax.f32 %v2552_v24, 0.0 }
 0x337   :  { %v2558_v4 = vadd.f32 %v2557_v12, %v5529_v60  ;;  %v2663_v26 = vmax.f32 %v2554_v43, 0.0 }
 0x338   :  { %v2664_v53 = vmax.f32 %v2556_v25, 0.0 }
 0x339   :  { %v2665_v14 = vmax.f32 %v2558_v4, 0.0 }
 0x33a   :  { %v2710_v61 = vpack.c.bf16 %v2664_v53, %v2662_v48 }
 0x33b   :  { %v2711_v1 = vpack.c.bf16 %v2665_v14, %v2663_v26  ;;  %v2561_v5 = vpop.f32.mrb[100].mxu1 }
 0x33c   :  { %v2562_v27 = vadd.f32 %v2561_v5, %v5525_v54  ;;  %v2563_v51 = vpop.f32.mrb[101].mxu1 }
 0x33d   :  { %v2564_v44 = vadd.f32 %v2563_v51, %v5529_v60  ;;  %v2565_v15 = vpop.f32.mrb[102].mxu1  ;;  %2957 = vmatprep.mubr.bf16.mxu1 %v2711_v1 }
 0x33e   :  { %v2566_v28 = vadd.f32 %v2565_v15, %v5525_v54  ;;  %v2567_v62 = vpop.f32.mrb[103].mxu1  ;;  %2958 = vmatmul.mubr.bf16.gmra.mrb[160].mxu1 %v2710_v61  ;;  %v2666_v46 = vmax.f32 %v2562_v27, 0.0 }
 0x33f   :  { %v2568_v45 = vadd.f32 %v2567_v62, %v5529_v60  ;;  %v2667_v16 = vmax.f32 %v2564_v44, 0.0 }
 0x340   :  { %v2668_v29 = vmax.f32 %v2566_v28, 0.0 }
 0x341   :  { %v2669_v41 = vmax.f32 %v2568_v45, 0.0 }
 0x342   :  { %v2712_v30 = vpack.c.bf16 %v2668_v29, %v2666_v46 }
 0x343   :  { %v2713_v56 = vpack.c.bf16 %v2669_v41, %v2667_v16  ;;  %v2571_v6 = vpop.f32.mrb[104].mxu1 }
 0x344   :  { %v2572_v17 = vadd.f32 %v2571_v6, %v5525_v54  ;;  %v2573_v63 = vpop.f32.mrb[105].mxu1 }
 0x345   :  { %v2574_v7 = vadd.f32 %v2573_v63, %v5529_v60  ;;  %v2575_v18 = vpop.f32.mrb[106].mxu1  ;;  %2965 = vmatprep.mubr.bf16.mxu1 %v2713_v56 }
 0x346   :  { %v2576_v47 = vadd.f32 %v2575_v18, %v5525_v54  ;;  %v2577_v37 = vpop.f32.mrb[107].mxu1  ;;  %2966 = vmatmul.mubr.bf16.gmra.mrb[164].mxu1 %v2712_v30  ;;  %v2670_v57 = vmax.f32 %v2572_v17, 0.0 }
 0x347   :  { %v2578_v31 = vadd.f32 %v2577_v37, %v5529_v60  ;;  %v2671_v0 = vmax.f32 %v2574_v7, 0.0 }
 0x348   :  { %v2672_v8 = vmax.f32 %v2576_v47, 0.0 }
 0x349   :  { %v2673_v32 = vmax.f32 %v2578_v31, 0.0 }
 0x34a   :  { %v2714_v39 = vpack.c.bf16 %v2672_v8, %v2670_v57 }
 0x34b   :  { %v2715_v19 = vpack.c.bf16 %v2673_v32, %v2671_v0  ;;  %v2581_v42 = vpop.f32.mrb[108].mxu1 }
 0x34c   :  { %v2582_v49 = vadd.f32 %v2581_v42, %v5525_v54  ;;  %v2583_v9 = vpop.f32.mrb[109].mxu1 }
 0x34d   :  { %v2584_v20 = vadd.f32 %v2583_v9, %v5529_v60  ;;  %v2585_v38 = vpop.f32.mrb[110].mxu1  ;;  %2973 = vmatprep.mubr.bf16.mxu1 %v2715_v19 }
 0x34e   :  { %v2586_v50 = vadd.f32 %v2585_v38, %v5525_v54  ;;  %v2587_v10 = vpop.f32.mrb[111].mxu1  ;;  %2974 = vmatmul.mubr.bf16.gmra.mrb[168].mxu1 %v2714_v39  ;;  %v2674_v58 = vmax.f32 %v2582_v49, 0.0 }
 0x34f   :  { %v2588_v21 = vadd.f32 %v2587_v10, %v5529_v60  ;;  %v2675_v22 = vmax.f32 %v2584_v20, 0.0 }
 0x350   :  { %v2676_v35 = vmax.f32 %v2586_v50, 0.0 }
 0x351   :  { %v2677_v2 = vmax.f32 %v2588_v21, 0.0 }
 0x352   :  { %v2716_v34 = vpack.c.bf16 %v2676_v35, %v2674_v58 }
 0x353   :  { %v2717_v36 = vpack.c.bf16 %v2677_v2, %v2675_v22  ;;  %v2591_v59 = vpop.f32.mrb[112].mxu1 }
 0x354   :  { %v2592_v11 = vadd.f32 %v2591_v59, %v5525_v54  ;;  %v2593_v3 = vpop.f32.mrb[113].mxu1 }
 0x355   :  { %v2594_v23 = vadd.f32 %v2593_v3, %v5529_v60  ;;  %v2595_v40 = vpop.f32.mrb[114].mxu1  ;;  %2981 = vmatprep.mubr.bf16.mxu1 %v2717_v36 }
 0x356   :  { %v2596_v52 = vadd.f32 %v2595_v40, %v5525_v54  ;;  %v2597_v13 = vpop.f32.mrb[115].mxu1  ;;  %2982 = vmatmul.mubr.bf16.gmra.mrb[172].mxu1 %v2716_v34  ;;  %v2678_v33 = vmax.f32 %v2592_v11, 0.0 }
 0x357   :  { %v2598_v24 = vadd.f32 %v2597_v13, %v5529_v60  ;;  %v2679_v55 = vmax.f32 %v2594_v23, 0.0 }
 0x358   :  { %v2680_v43 = vmax.f32 %v2596_v52, 0.0 }
 0x359   :  { %v2681_v25 = vmax.f32 %v2598_v24, 0.0 }
 0x35a   :  { %v2718_v12 = vpack.c.bf16 %v2680_v43, %v2678_v33 }
 0x35b   :  { %v2719_v4 = vpack.c.bf16 %v2681_v25, %v2679_v55  ;;  %v2601_v48 = vpop.f32.mrb[116].mxu1 }
 0x35c   :  { %v2602_v53 = vadd.f32 %v2601_v48, %v5525_v54  ;;  %v2603_v26 = vpop.f32.mrb[117].mxu1 }
 0x35d   :  { %v2604_v14 = vadd.f32 %v2603_v26, %v5529_v60  ;;  %v2605_v61 = vpop.f32.mrb[118].mxu1  ;;  %2989 = vmatprep.mubr.bf16.mxu1 %v2719_v4 }
 0x35e   :  { %v2606_v1 = vadd.f32 %v2605_v61, %v5525_v54  ;;  %v2607_v5 = vpop.f32.mrb[119].mxu1  ;;  %2990 = vmatmul.mubr.bf16.gmra.mrb[176].mxu1 %v2718_v12  ;;  %v2682_v51 = vmax.f32 %v2602_v53, 0.0 }
 0x35f   :  { %v2608_v27 = vadd.f32 %v2607_v5, %v5529_v60  ;;  %v2683_v15 = vmax.f32 %v2604_v14, 0.0 }
 0x360   :  { %v2684_v44 = vmax.f32 %v2606_v1, 0.0 }
 0x361   :  { %v2685_v28 = vmax.f32 %v2608_v27, 0.0 }
 0x362   :  { %v2720_v62 = vpack.c.bf16 %v2684_v44, %v2682_v51 }
 0x363   :  { %v2721_v45 = vpack.c.bf16 %v2685_v28, %v2683_v15  ;;  %v2611_v46 = vpop.f32.mrb[120].mxu1 }
 0x364   :  { %v2612_v29 = vadd.f32 %v2611_v46, %v5525_v54  ;;  %v2613_v16 = vpop.f32.mrb[121].mxu1 }
 0x365   :  { %v2614_v41 = vadd.f32 %v2613_v16, %v5529_v60  ;;  %v2615_v30 = vpop.f32.mrb[122].mxu1  ;;  %2997 = vmatprep.mubr.bf16.mxu1 %v2721_v45 }
 0x366   :  { %v2616_v56 = vadd.f32 %v2615_v30, %v5525_v54  ;;  %v2617_v6 = vpop.f32.mrb[123].mxu1  ;;  %2998 = vmatmul.mubr.bf16.gmra.mrb[180].mxu1 %v2720_v62  ;;  %v2686_v63 = vmax.f32 %v2612_v29, 0.0 }
 0x367   :  { %v2618_v17 = vadd.f32 %v2617_v6, %v5529_v60  ;;  %v2687_v18 = vmax.f32 %v2614_v41, 0.0 }
 0x368   :  { %v2688_v7 = vmax.f32 %v2616_v56, 0.0 }
 0x369   :  { %v2689_v47 = vmax.f32 %v2618_v17, 0.0 }
 0x36a   :  { %v2722_v37 = vpack.c.bf16 %v2688_v7, %v2686_v63 }
 0x36b   :  { %v2723_v31 = vpack.c.bf16 %v2689_v47, %v2687_v18  ;;  %v2621_v57 = vpop.f32.mrb[124].mxu1 }
 0x36c   :  { %v2622_v8 = vadd.f32 %v2621_v57, %v5525_v54  ;;  %v2623_v0 = vpop.f32.mrb[125].mxu1 }
 0x36d   :  { %v2624_v32 = vadd.f32 %v2623_v0, %v5529_v60  ;;  %v2625_v39 = vpop.f32.mrb[126].mxu1  ;;  %3005 = vmatprep.mubr.bf16.mxu1 %v2723_v31 }
 0x36e   :  { %v2626_v19 = vadd.f32 %v2625_v39, %v5525_v54  ;;  %v2627_v42 = vpop.f32.mrb[127].mxu1  ;;  %3006 = vmatmul.mubr.bf16.gmra.mrb[184].mxu1 %v2722_v37  ;;  %v2690_v9 = vmax.f32 %v2622_v8, 0.0  ;;  %v5598_v54 = vld [vmem:[%s5650_s6] ss:$0 sm:$0xff]  ;;  %s4400_s6 = smov [#allocation2]  }
 0x36f   :  { %v2628_v49 = vadd.f32 %v2627_v42, %v5529_v60  ;;  %v2691_v38 = vmax.f32 %v2624_v32, 0.0  ;;  %s3187_s22 = sshll.u32 %s4400_s6, 4  ;;  %s3188_s22 = int_to_ptr.vmem [resolvable:$true] %s3187_s22 }
 0x370   :  { %v2692_v20 = vmax.f32 %v2626_v19, 0.0  ;;  %s4375_s23 = scalar_lea.vmem %s3188_s22, 2048  ;;  %p4380_p1 = scmp.lt.s32.totalorder %s3188_s22, %s3188_s22 }
 0x371   :  { %v2693_v50 = vmax.f32 %v2628_v49, 0.0  ;;  %p4376_p0 = scmp.ne.s32.totalorder %s3188_s22, %s4375_s23  ;;  %p4381_p2 = scmp.lt.s32.totalorder %s4375_s23, %s4375_s23 }
 0x372   :  { %v2724_v10 = vpack.c.bf16 %v2692_v20, %v2690_v9 }
 0x373   :  { %v2725_v21 = vpack.c.bf16 %v2693_v50, %v2691_v38  ;;  %p4382_p3 = por %p4381_p2, %p4380_p1 }
 0x375   :  { %3013 = vmatprep.mubr.bf16.mxu1 %v2725_v21  ;;  %p4383_p4 = pnand %p4382_p3, %p4376_p0 }
 0x376   :  { %3014 = vmatmul.mubr.bf16.gmra.mrb[188].mxu1 %v2724_v10 }
 0x3d1   :  { %v3648_v58 = vpop.f32.mrb[128].mxu1 }
 0x3d2   :  { %v3649_v35 = vpop.f32.mrb[129].mxu1 }
 0x3d3   :  { %v3650_v22 = vadd.f32 %v3649_v35, %v3648_v58  ;;  %v3651_v2 = vpop.f32.mrb[130].mxu1 }
 0x3d4   :  { %v3652_v34 = vpop.f32.mrb[131].mxu1 }
 0x3d5   :  { %v3653_v36 = vadd.f32 %v3652_v34, %v3651_v2  ;;  %v2896_v60 = vadd.f32 %v3650_v22, %v5598_v54 }
 0x3d7   :  { %v2899_v59 = vadd.f32 %v3653_v36, %v5598_v54 }
 0x3d9   :  { %v3540_v11 = vpack.c.bf16 %v2899_v59, %v2896_v60  ;;  %v3654_v3 = vpop.f32.mrb[132].mxu1 }
 0x3da   :  { %v3655_v23 = vpop.f32.mrb[133].mxu1 }
 0x3db   :  { %3541 = vst [vmem:[#allocation2] sm:$0xff] %v3540_v11   ;;  %v3656_v40 = vadd.f32 %v3655_v23, %v3654_v3  ;;  %v3657_v52 = vpop.f32.mrb[134].mxu1 }
 0x3dc   :  { %v3658_v13 = vpop.f32.mrb[135].mxu1 }
 0x3dd   :  { %v3659_v24 = vadd.f32 %v3658_v13, %v3657_v52  ;;  %v2904_v33 = vadd.f32 %v3656_v40, %v5598_v54 }
 0x3df   :  { %v2907_v43 = vadd.f32 %v3659_v24, %v5598_v54 }
 0x3e1   :  { %v3545_v55 = vpack.c.bf16 %v2907_v43, %v2904_v33  ;;  %v3660_v25 = vpop.f32.mrb[136].mxu1 }
 0x3e2   :  { %v3661_v12 = vpop.f32.mrb[137].mxu1 }
 0x3e3   :  { %3617 = vst [vmem:[#allocation2 + $0x8] sm:$0xff] %v3545_v55   ;;  %v3662_v4 = vadd.f32 %v3661_v12, %v3660_v25  ;;  %v3663_v48 = vpop.f32.mrb[138].mxu1 }
 0x3e4   :  { %v3664_v53 = vpop.f32.mrb[139].mxu1 }
 0x3e5   :  { %v3665_v26 = vadd.f32 %v3664_v53, %v3663_v48  ;;  %v2912_v14 = vadd.f32 %v3662_v4, %v5598_v54 }
 0x3e7   :  { %v2915_v61 = vadd.f32 %v3665_v26, %v5598_v54 }
 0x3e9   :  { %v3550_v1 = vpack.c.bf16 %v2915_v61, %v2912_v14  ;;  %v3666_v5 = vpop.f32.mrb[140].mxu1 }
 0x3ea   :  { %v3667_v27 = vpop.f32.mrb[141].mxu1 }
 0x3eb   :  { %3618 = vst [vmem:[#allocation2 + $0x10] sm:$0xff] %v3550_v1   ;;  %v3668_v51 = vadd.f32 %v3667_v27, %v3666_v5  ;;  %v3669_v44 = vpop.f32.mrb[142].mxu1 }
 0x3ec   :  { %v3670_v15 = vpop.f32.mrb[143].mxu1 }
 0x3ed   :  { %v3671_v28 = vadd.f32 %v3670_v15, %v3669_v44  ;;  %v2920_v62 = vadd.f32 %v3668_v51, %v5598_v54 }
 0x3ef   :  { %v2923_v45 = vadd.f32 %v3671_v28, %v5598_v54 }
 0x3f1   :  { %v3555_v46 = vpack.c.bf16 %v2923_v45, %v2920_v62  ;;  %v3672_v29 = vpop.f32.mrb[144].mxu1 }
 0x3f2   :  { %v3673_v16 = vpop.f32.mrb[145].mxu1 }
 0x3f3   :  { %3619 = vst [vmem:[#allocation2 + $0x18] sm:$0xff] %v3555_v46   ;;  %v3674_v41 = vadd.f32 %v3673_v16, %v3672_v29  ;;  %v3675_v30 = vpop.f32.mrb[146].mxu1 }
 0x3f4   :  { %v3676_v56 = vpop.f32.mrb[147].mxu1 }
 0x3f5   :  { %v3677_v6 = vadd.f32 %v3676_v56, %v3675_v30  ;;  %v2928_v17 = vadd.f32 %v3674_v41, %v5598_v54 }
 0x3f7   :  { %v2931_v63 = vadd.f32 %v3677_v6, %v5598_v54 }
 0x3f9   :  { %v3560_v7 = vpack.c.bf16 %v2931_v63, %v2928_v17  ;;  %v3678_v18 = vpop.f32.mrb[148].mxu1 }
 0x3fa   :  { %v3679_v47 = vpop.f32.mrb[149].mxu1 }
 0x3fb   :  { %3620 = vst [vmem:[#allocation2 + $0x20] sm:$0xff] %v3560_v7   ;;  %v3680_v37 = vadd.f32 %v3679_v47, %v3678_v18  ;;  %v3681_v31 = vpop.f32.mrb[150].mxu1 }
 0x3fc   :  { %v3682_v57 = vpop.f32.mrb[151].mxu1 }
 0x3fd   :  { %v3683_v8 = vadd.f32 %v3682_v57, %v3681_v31  ;;  %v2936_v0 = vadd.f32 %v3680_v37, %v5598_v54 }
 0x3ff   :  { %v2939_v32 = vadd.f32 %v3683_v8, %v5598_v54 }
 0x401   :  { %v3565_v39 = vpack.c.bf16 %v2939_v32, %v2936_v0  ;;  %v3684_v19 = vpop.f32.mrb[152].mxu1 }
 0x402   :  { %v3685_v42 = vpop.f32.mrb[153].mxu1 }
 0x403   :  { %3621 = vst [vmem:[#allocation2 + $0x28] sm:$0xff] %v3565_v39   ;;  %v3686_v49 = vadd.f32 %v3685_v42, %v3684_v19  ;;  %v3687_v9 = vpop.f32.mrb[154].mxu1 }
 0x404   :  { %v3688_v20 = vpop.f32.mrb[155].mxu1 }
 0x405   :  { %v3689_v38 = vadd.f32 %v3688_v20, %v3687_v9  ;;  %v2944_v50 = vadd.f32 %v3686_v49, %v5598_v54 }
 0x407   :  { %v2947_v10 = vadd.f32 %v3689_v38, %v5598_v54 }
 0x409   :  { %v3570_v21 = vpack.c.bf16 %v2947_v10, %v2944_v50  ;;  %v3690_v58 = vpop.f32.mrb[156].mxu1 }
 0x40a   :  { %v3691_v35 = vpop.f32.mrb[157].mxu1 }
 0x40b   :  { %3622 = vst [vmem:[#allocation2 + $0x30] sm:$0xff] %v3570_v21   ;;  %v3692_v22 = vadd.f32 %v3691_v35, %v3690_v58  ;;  %v3693_v2 = vpop.f32.mrb[158].mxu1 }
 0x40c   :  { %v3694_v34 = vpop.f32.mrb[159].mxu1 }
 0x40d   :  { %v3695_v36 = vadd.f32 %v3694_v34, %v3693_v2  ;;  %v2952_v60 = vadd.f32 %v3692_v22, %v5598_v54 }
 0x40f   :  { %v2955_v59 = vadd.f32 %v3695_v36, %v5598_v54 }
 0x411   :  { %v3575_v11 = vpack.c.bf16 %v2955_v59, %v2952_v60  ;;  %v3696_v3 = vpop.f32.mrb[160].mxu1 }
 0x412   :  { %v3697_v23 = vpop.f32.mrb[161].mxu1 }
 0x413   :  { %3623 = vst [vmem:[#allocation2 + $0x38] sm:$0xff] %v3575_v11   ;;  %v3698_v40 = vadd.f32 %v3697_v23, %v3696_v3  ;;  %v3699_v52 = vpop.f32.mrb[162].mxu1 }
 0x414   :  { %v3700_v13 = vpop.f32.mrb[163].mxu1 }
 0x415   :  { %v3701_v24 = vadd.f32 %v3700_v13, %v3699_v52  ;;  %v2960_v33 = vadd.f32 %v3698_v40, %v5598_v54 }
 0x417   :  { %v2963_v43 = vadd.f32 %v3701_v24, %v5598_v54 }
 0x419   :  { %v3580_v55 = vpack.c.bf16 %v2963_v43, %v2960_v33  ;;  %v3702_v25 = vpop.f32.mrb[164].mxu1 }
 0x41a   :  { %v3703_v12 = vpop.f32.mrb[165].mxu1 }
 0x41b   :  { %3624 = vst [vmem:[#allocation2 + $0x40] sm:$0xff] %v3580_v55   ;;  %v3704_v4 = vadd.f32 %v3703_v12, %v3702_v25  ;;  %v3705_v48 = vpop.f32.mrb[166].mxu1 }
 0x41c   :  { %v3706_v53 = vpop.f32.mrb[167].mxu1 }
 0x41d   :  { %v3707_v26 = vadd.f32 %v3706_v53, %v3705_v48  ;;  %v2968_v14 = vadd.f32 %v3704_v4, %v5598_v54 }
 0x41f   :  { %v2971_v61 = vadd.f32 %v3707_v26, %v5598_v54 }
 0x421   :  { %v3585_v1 = vpack.c.bf16 %v2971_v61, %v2968_v14  ;;  %v3708_v5 = vpop.f32.mrb[168].mxu1 }
 0x422   :  { %v3709_v27 = vpop.f32.mrb[169].mxu1 }
 0x423   :  { %3625 = vst [vmem:[#allocation2 + $0x48] sm:$0xff] %v3585_v1   ;;  %v3710_v51 = vadd.f32 %v3709_v27, %v3708_v5  ;;  %v3711_v44 = vpop.f32.mrb[170].mxu1 }
 0x424   :  { %v3712_v15 = vpop.f32.mrb[171].mxu1 }
 0x425   :  { %v3713_v28 = vadd.f32 %v3712_v15, %v3711_v44  ;;  %v2976_v62 = vadd.f32 %v3710_v51, %v5598_v54 }
 0x427   :  { %v2979_v45 = vadd.f32 %v3713_v28, %v5598_v54 }
 0x429   :  { %v3590_v46 = vpack.c.bf16 %v2979_v45, %v2976_v62  ;;  %v3714_v29 = vpop.f32.mrb[172].mxu1 }
 0x42a   :  { %v3715_v16 = vpop.f32.mrb[173].mxu1 }
 0x42b   :  { %3626 = vst [vmem:[#allocation2 + $0x50] sm:$0xff] %v3590_v46   ;;  %v3716_v41 = vadd.f32 %v3715_v16, %v3714_v29  ;;  %v3717_v30 = vpop.f32.mrb[174].mxu1 }
 0x42c   :  { %v3718_v56 = vpop.f32.mrb[175].mxu1 }
 0x42d   :  { %v3719_v6 = vadd.f32 %v3718_v56, %v3717_v30  ;;  %v2984_v17 = vadd.f32 %v3716_v41, %v5598_v54 }
 0x42f   :  { %v2987_v63 = vadd.f32 %v3719_v6, %v5598_v54 }
 0x431   :  { %v3595_v7 = vpack.c.bf16 %v2987_v63, %v2984_v17  ;;  %v3720_v18 = vpop.f32.mrb[176].mxu1 }
 0x432   :  { %v3721_v47 = vpop.f32.mrb[177].mxu1 }
 0x433   :  { %3627 = vst [vmem:[#allocation2 + $0x58] sm:$0xff] %v3595_v7   ;;  %v3722_v37 = vadd.f32 %v3721_v47, %v3720_v18  ;;  %v3723_v31 = vpop.f32.mrb[178].mxu1 }
 0x434   :  { %v3724_v57 = vpop.f32.mrb[179].mxu1 }
 0x435   :  { %v3725_v8 = vadd.f32 %v3724_v57, %v3723_v31  ;;  %v2992_v0 = vadd.f32 %v3722_v37, %v5598_v54 }
 0x437   :  { %v2995_v32 = vadd.f32 %v3725_v8, %v5598_v54 }
 0x439   :  { %v3600_v39 = vpack.c.bf16 %v2995_v32, %v2992_v0  ;;  %v3726_v19 = vpop.f32.mrb[180].mxu1 }
 0x43a   :  { %v3727_v42 = vpop.f32.mrb[181].mxu1 }
 0x43b   :  { %3628 = vst [vmem:[#allocation2 + $0x60] sm:$0xff] %v3600_v39   ;;  %v3728_v49 = vadd.f32 %v3727_v42, %v3726_v19  ;;  %v3729_v9 = vpop.f32.mrb[182].mxu1 }
 0x43c   :  { %v3730_v20 = vpop.f32.mrb[183].mxu1 }
 0x43d   :  { %v3731_v38 = vadd.f32 %v3730_v20, %v3729_v9  ;;  %v3000_v50 = vadd.f32 %v3728_v49, %v5598_v54 }
 0x43f   :  { %v3003_v10 = vadd.f32 %v3731_v38, %v5598_v54 }
 0x441   :  { %v3605_v21 = vpack.c.bf16 %v3003_v10, %v3000_v50  ;;  %v3732_v58 = vpop.f32.mrb[184].mxu1 }
 0x442   :  { %v3733_v35 = vpop.f32.mrb[185].mxu1 }
 0x443   :  { %3629 = vst [vmem:[#allocation2 + $0x68] sm:$0xff] %v3605_v21   ;;  %v3734_v22 = vadd.f32 %v3733_v35, %v3732_v58  ;;  %v3735_v2 = vpop.f32.mrb[186].mxu1 }
 0x444   :  { %v3736_v34 = vpop.f32.mrb[187].mxu1 }
 0x445   :  { %v3737_v36 = vadd.f32 %v3736_v34, %v3735_v2  ;;  %v3008_v60 = vadd.f32 %v3734_v22, %v5598_v54 }
 0x447   :  { %v3011_v59 = vadd.f32 %v3737_v36, %v5598_v54 }
 0x449   :  { %v3610_v11 = vpack.c.bf16 %v3011_v59, %v3008_v60  ;;  %v3738_v3 = vpop.f32.mrb[188].mxu1 }
 0x44a   :  { %v3739_v23 = vpop.f32.mrb[189].mxu1 }
 0x44b   :  { %3630 = vst [vmem:[#allocation2 + $0x70] sm:$0xff] %v3610_v11   ;;  %v3740_v40 = vadd.f32 %v3739_v23, %v3738_v3  ;;  %v3741_v52 = vpop.f32.mrb[190].mxu1 }
 0x44c   :  { %v3742_v13 = vpop.f32.mrb[191].mxu1 }
 0x44d   :  { %v3743_v24 = vadd.f32 %v3742_v13, %v3741_v52  ;;  %v3016_v33 = vadd.f32 %v3740_v40, %v5598_v54 }
 0x44f   :  { %v3019_v43 = vadd.f32 %v3743_v24, %v5598_v54 }
 0x451   :  { %v3615_v55 = vpack.c.bf16 %v3019_v43, %v3016_v33 }
 0x453   :  { %3631 = vst [vmem:[#allocation2 + $0x78] sm:$0xff] %v3615_v55  }
 0x454   :  { %4386 = shalt.err (!%p4383_p4)
}
 0x455   :  { %s4387_s25 = scalar_lea.hbm %s5651_s7, 2048 }
 0x456   :  { %p4388_p5 = scmp.ne.s32.totalorder %s5651_s7, %s4387_s25  ;;  %p4391_p6 = scmp.lt.u32.totalorder %s4387_s25, %s5651_s7 }
 0x458   :  { %p4393_p7 = pnand %p4391_p6, %p4388_p5 }
 0x45a   :  { %4396 = shalt.err (!%p4393_p7)
}
 0x45b   :  { %s4401_s30 = smov 64   ;;  %s4402_s8 = smov 4  }
 0x45c   :  { %3193 = dma.vmem_to_hbm [thread:$0]  %s3188_s22, 2048, %s5651_s7, [#allocation3], %s4401_s30, %s4401_s30, %s4402_s8  }
 0x45d   :  { %4397 = dma.done.wait [#allocation3], 2048  }
 0x45e   :  { %4398 = vsyncadd [#allocation3], 4294965248 }
 0x45f   :  { %3197 = vsyncpa [#allocation3], 1 }

</bundles_post_ra>
